<compile_context>
chip_gen: v7x
topology: tpu7x:2x2x1
jax: 0.10.0
libtpu: 0.0.40
codegen_flags: <defaults>
</compile_context>

<pallas_src>
import functools

import jax
import jax.numpy as jnp
from jax.experimental import pallas as pl
from jax.experimental.pallas import tpu as pltpu

RATIO = 0.8          # TopKPooling ratio
NEG = -1.0e30        # finite "minus infinity" for masking (scores are in [-1, 1])


# ----------------------------------------------------------------------------
# Single fused kernel: whole network forward, grid=() (one invocation).
# ----------------------------------------------------------------------------
def net_kernel(x_ref, adj_ref, bvec_ref, wcat_ref, aux_ref, w1_ref, wmlp_ref,
               o_ref):
    n = x_ref.shape[0]
    f = o_ref.shape[1]                      # 128 (hidden width, lane-dense)
    b_graphs = o_ref.shape[0]
    n_layers = wcat_ref.shape[0]            # 3

    # index matrices used for the (N,1) <-> (1,N) orientation swap and the
    # pairwise top-k ranking.  All 2-D, no in-kernel transposes.
    idx_r = jax.lax.broadcasted_iota(jnp.int32, (n, n), 0)   # row index i
    idx_c = jax.lax.broadcasted_iota(jnp.int32, (n, n), 1)   # col index j
    eye_b = idx_r == idx_c

    def to_row(col):  # (n,1) f32 -> (1,n) f32, NaN-safe (select, not mul)
        return jnp.sum(jnp.where(eye_b, col, 0.0), axis=0, keepdims=True)

    adj = adj_ref[...]                       # (n, n) bf16 (0/1, exact)
    bvec_col = bvec_ref[...]                 # (n, 1) f32 graph id per node
    bvec_row = to_row(bvec_col)              # (1, n)
    same_g = bvec_col == bvec_row            # (n, n) same-graph mask

    # hoisted, loop-invariant per-graph membership masks
    member_cols = [bvec_col == float(b) for b in range(b_graphs)]  # (n,1) bool

    keep_col = jnp.ones((n, 1), jnp.float32)     # cumulative alive mask
    keep_row = jnp.ones((1, n), jnp.float32)

    x_bf = x_ref[...]                        # (n, f) bf16 layer-1 input (padded)
    feat_acc = [jnp.zeros((1, 2 * f), jnp.float32) for _ in range(b_graphs)]

    for l in range(n_layers):                # unrolled: 3 layers
        # ---- GraphConv(aggr='add') + ReLU, fused root/rel weights ----
        # xw = x @ [W_root | W_rel]  : one (n,f)x(f,2f) bf16 matmul -> f32
        xw = jnp.dot(x_bf, wcat_ref[l], preferred_element_type=jnp.float32)
        xr = xw[:, :f]                       # x @ W_root
        xe = xw[:, f:]                       # x @ W_rel
        # No adjacency masking needed: dropped nodes have zero rows in x (hence
        # zero rows in xe), and conv outputs of dropped nodes are never consumed.
        agg = jnp.dot(adj, xe.astype(jnp.bfloat16),
                      preferred_element_type=jnp.float32)
        h = jnp.maximum(xr + agg + aux_ref[l:l + 1, :], 0.0)          # (n,f) f32

        # ---- TopKPooling score: tanh(h . p/||p||)  (p pre-normalized on host) ----
        pn = aux_ref[n_layers + l:n_layers + l + 1, :]                # (1, f)
        score = jnp.tanh(jnp.sum(h * pn, axis=1, keepdims=True))      # (n, 1)

        # ---- per-graph top-k keep mask: rank among alive same-graph nodes ----
        alive_col = keep_col > 0.5                                    # (n,1) bool
        alive_row = keep_row > 0.5                                    # (1,n) bool
        s_col = jnp.where(alive_col, score, NEG)                      # (n, 1)
        s_row = to_row(s_col)                                         # (1, n)
        valid = same_g & alive_row                    # j alive & same graph as i
        count = jnp.sum(jnp.where(valid, 1.0, 0.0), axis=1, keepdims=True)
        k_i = jnp.ceil(RATIO * count)
        better = (s_row > s_col) | ((s_row == s_col) & (idx_c < idx_r))
        rank = jnp.sum(jnp.where(valid & better, 1.0, 0.0), axis=1, keepdims=True)
        new_alive = alive_col & (rank < k_i)
        keep_col = new_alive.astype(jnp.float32)
        keep_row = to_row(keep_col)

        # ---- gate survivors: x <- relu(h) * tanh(score); dropped rows -> 0 ----
        g = score * keep_col                                          # (n, 1)
        x = h * g                                                     # (n, f) f32
        x_bf = x.astype(jnp.bfloat16)                 # next layer's MXU operand

        # ---- readout: [global_max_pool || global_mean_pool], summed over layers ----
        for b in range(b_graphs):                     # unrolled: B graphs
            m = member_cols[b] & new_alive                            # (n,1) bool
            m_f = m.astype(jnp.float32)
            cnt = jnp.sum(m_f, keepdims=True)                         # (1, 1)
            mean_b = jnp.sum(x * m_f, axis=0, keepdims=True) / jnp.maximum(cnt, 1.0)
            mx_b = jnp.max(jnp.where(m, x, NEG), axis=0, keepdims=True)
            mx_b = jnp.where(cnt > 0.5, mx_b, 0.0)                    # empty-graph guard
            feat_acc[b] = feat_acc[b] + jnp.concatenate([mx_b, mean_b], axis=1)

    feats = jnp.concatenate(feat_acc, axis=0)                         # (B, 2f) f32

    # ---- MLP head (F.dropout(p=0.5) is identity in eval / deterministic mode) ----
    b1 = aux_ref[2 * n_layers:2 * n_layers + 1, :]
    b2 = aux_ref[2 * n_layers + 1:2 * n_layers + 2, :]
    b3 = aux_ref[2 * n_layers + 2:2 * n_layers + 3, :]
    h1 = jnp.maximum(
        jnp.dot(feats.astype(jnp.bfloat16), w1_ref[...],
                preferred_element_type=jnp.float32) + b1, 0.0)
    h2 = jnp.maximum(
        jnp.dot(h1.astype(jnp.bfloat16), wmlp_ref[0],
                preferred_element_type=jnp.float32) + b2, 0.0)
    # w3 / b3 are zero-padded to 128 lanes so this final store is lane-dense.
    o_ref[...] = jnp.dot(h2.astype(jnp.bfloat16), wmlp_ref[1],
                         preferred_element_type=jnp.float32) + b3


# ----------------------------------------------------------------------------
# Wrapper: single pallas_call, whole arrays in VMEM (N is tiny).
# ----------------------------------------------------------------------------
def _full_spec(shape):
    nd = len(shape)
    return pl.BlockSpec(shape, lambda *_, nd=nd: (0,) * nd)


@functools.partial(jax.jit, static_argnames=("num_graphs",))
def net_forward(packed, x, adj, batch, num_graphs):
    # TODO(synk): to amortize dispatch on v6e/v7x, batch more graphs (larger N/B)
    # into a single call at this level rather than calling per tiny batch.
    n, f_in = x.shape
    f = packed["wcat"].shape[1]                       # 128
    # zero-pad layer-1 features to a lane-full K dim; bf16 operand for the MXU
    x_pad = (jnp.zeros((n, f), jnp.float32)
             .at[:, :f_in].set(x.astype(jnp.float32))
             .astype(jnp.bfloat16))
    bvec = batch.astype(jnp.float32).reshape(n, 1)    # graph-id column (f32 math)
    adj_bf = adj.astype(jnp.bfloat16)                 # 0/1, exact in bf16

    args = (x_pad, adj_bf, bvec,
            packed["wcat"], packed["aux"], packed["w1"], packed["wmlp"])

    out_bytes = num_graphs * f * 4
    in_bytes = sum(int(a.size) * jnp.dtype(a.dtype).itemsize for a in args)
    vmem_limit = int(2 * in_bytes + 2 * out_bytes) + (16 << 20)   # footprint + headroom

    out_pad = pl.pallas_call(
        net_kernel,
        out_shape=jax.ShapeDtypeStruct((num_graphs, f), jnp.float32),
        in_specs=[_full_spec(a.shape) for a in args],
        out_specs=_full_spec((num_graphs, f)),
        compiler_params=pltpu.CompilerParams(vmem_limit_bytes=vmem_limit),
    )(*args)
    return out_pad[:, :1]                             # (B, 1) logits


# ----------------------------------------------------------------------------
# Parameters (shapes from the PyTorch module __init__) + packing for the kernel.
# ----------------------------------------------------------------------------
def init_params(key):
    def dense(k, fi, fo):
        return jax.random.normal(k, (fi, fo), jnp.float32) / jnp.sqrt(float(fi))

    keys = jax.random.split(key, 16)
    params = {}
    dims = [(20, 128), (128, 128), (128, 128)]
    for i, (fi, fo) in enumerate(dims, start=1):
        params[f"conv{i}"] = {
            "w_root": dense(keys[3 * i - 3], fi, fo),
            "w_rel": dense(keys[3 * i - 2], fi, fo),
            "b": jnp.zeros((1, fo), jnp.float32),
        }
        params[f"pool{i}"] = {"p": dense(keys[3 * i - 1], fo, 1)}
    params["mlp"] = {
        "w1": dense(keys[9], 256, 128), "b1": jnp.zeros((1, 128), jnp.float32),
        "w2": dense(keys[10], 128, 64), "b2": jnp.zeros((1, 64), jnp.float32),
        "w3": dense(keys[11], 64, 1),   "b3": jnp.zeros((1, 1), jnp.float32),
    }
    return params


def pack_params(params):
    f = params["conv1"]["w_root"].shape[1]            # 128

    def pad_k(w):   # zero-pad K (input) dim up to f
        return jnp.zeros((f, f), jnp.float32).at[:w.shape[0], :].set(w)

    # stacked [W_root | W_rel] per layer -> (3, 128, 256) bf16 (one matmul/layer)
    wcat_layers = []
    for i in (1, 2, 3):
        wr = params[f"conv{i}"]["w_root"]
        we = params[f"conv{i}"]["w_rel"]
        if wr.shape[0] != f:
            wr, we = pad_k(wr), pad_k(we)
        wcat_layers.append(jnp.concatenate([wr, we], axis=1))          # (f, 2f)
    wcat = jnp.stack(wcat_layers).astype(jnp.bfloat16)                 # (3, f, 2f)

    # aux slab (9, 128) f32: conv biases, pre-normalized pool vectors, MLP biases
    cbias = jnp.concatenate([params[f"conv{i}"]["b"] for i in (1, 2, 3)], axis=0)
    pool_rows = []
    for i in (1, 2, 3):
        p = params[f"pool{i}"]["p"].reshape(1, f)
        pool_rows.append(p / jnp.sqrt(jnp.sum(p * p)))                 # p / ||p||
    pool = jnp.concatenate(pool_rows, axis=0)                          # (3, f)
    mlp = params["mlp"]
    b1 = mlp["b1"]                                                     # (1, 128)
    b2p = jnp.zeros((1, f), jnp.float32).at[:, :mlp["b2"].shape[1]].set(mlp["b2"])
    b3p = jnp.zeros((1, f), jnp.float32).at[:, :mlp["b3"].shape[1]].set(mlp["b3"])
    aux = jnp.concatenate([cbias, pool, b1, b2p, b3p], axis=0)         # (9, 128)

    # MLP weights: w1 stays (256,128); w2/w3 zero-padded to 128 lanes and stacked
    w1 = mlp["w1"].astype(jnp.bfloat16)
    w2p = jnp.zeros((f, f), jnp.float32).at[:, :mlp["w2"].shape[1]].set(mlp["w2"])
    w3p = (jnp.zeros((f, f), jnp.float32)
           .at[:mlp["w3"].shape[0], :mlp["w3"].shape[1]].set(mlp["w3"]))
    wmlp = jnp.stack([w2p, w3p]).astype(jnp.bfloat16)                  # (2, 128, 128)

    return dict(wcat=wcat, aux=aux, w1=w1, wmlp=wmlp)


# ----------------------------------------------------------------------------
if __name__ == "__main__":
    key = jax.random.PRNGKey(0)
    k_par, k_x, k_adj = jax.random.split(key, 3)

    num_graphs = 2
    nodes_per_graph = 8
    n = num_graphs * nodes_per_graph
    feat = 20

    params = init_params(k_par)
    packed = pack_params(params)

    x = jax.random.normal(k_x, (n, feat), jnp.float32)
    batch = jnp.repeat(jnp.arange(num_graphs, dtype=jnp.int32), nodes_per_graph)

    # random block-diagonal, symmetric adjacency (no self-loops)
    rand = (jax.random.uniform(k_adj, (n, n)) < 0.3).astype(jnp.float32)
    same = (batch[:, None] == batch[None, :]).astype(jnp.float32)
    adj = jnp.maximum(rand, rand.T) * same * (1.0 - jnp.eye(n, dtype=jnp.float32))

    out = net_forward(packed, x, adj, batch, num_graphs=num_graphs)
    jax.block_until_ready(out)
    assert out.shape == (num_graphs, 1)
    print("KERNEL_OK")
</pallas_src>

<mosaic_0001>
module attributes {stable_mosaic.version = 11 : i64} {
  func.func @net_kernel(%arg0: memref<16x128xbf16, #tpu.memory_space<vmem>>, %arg1: memref<16x16xbf16, #tpu.memory_space<vmem>>, %arg2: memref<16x1xf32, #tpu.memory_space<vmem>>, %arg3: memref<3x128x256xbf16, #tpu.memory_space<vmem>>, %arg4: memref<9x128xf32, #tpu.memory_space<vmem>>, %arg5: memref<256x128xbf16, #tpu.memory_space<vmem>>, %arg6: memref<2x128x128xbf16, #tpu.memory_space<vmem>>, %arg7: memref<2x128xf32, #tpu.memory_space<vmem>>) attributes {dimension_semantics = [], scalar_prefetch = 0 : i64, scratch_operands = 0 : i64, tpu.core_type = #tpu.core_type<tc>} {
    %0 = tpu.iota {dimensions = array<i32: 0>} : vector<16x16xi32>
    %1 = tpu.iota {dimensions = array<i32: 1>} : vector<16x16xi32>
    %2 = arith.cmpi eq, %0, %1 : vector<16x16xi32>
    %c0 = arith.constant 0 : index
    %c0_0 = arith.constant 0 : index
    %3 = vector.load %arg1[%c0, %c0_0] : memref<16x16xbf16, #tpu.memory_space<vmem>>, vector<16x16xbf16>
    %c0_1 = arith.constant 0 : index
    %c0_2 = arith.constant 0 : index
    %4 = vector.load %arg2[%c0_1, %c0_2] : memref<16x1xf32, #tpu.memory_space<vmem>>, vector<16x1xf32>
    %cst = arith.constant 0.000000e+00 : f32
    %5 = vector.shape_cast %4 : vector<16x1xf32> to vector<16x1xf32>
    %6 = vector.broadcast %5 : vector<16x1xf32> to vector<16x16xf32>
    %7 = vector.broadcast %cst : f32 to vector<16x16xf32>
    %8 = arith.select %2, %6, %7 : vector<16x16xi1>, vector<16x16xf32>
    %cst_3 = arith.constant dense<0.000000e+00> : vector<16xf32>
    %9 = vector.multi_reduction <add>, %8, %cst_3 [0] : vector<16x16xf32> to vector<16xf32>
    %10 = vector.shape_cast %9 : vector<16xf32> to vector<1x16xf32>
    %11 = vector.broadcast %4 : vector<16x1xf32> to vector<16x16xf32>
    %12 = vector.broadcast %10 : vector<1x16xf32> to vector<16x16xf32>
    %13 = arith.cmpf oeq, %11, %12 : vector<16x16xf32>
    %cst_4 = arith.constant 0.000000e+00 : f32
    %14 = vector.broadcast %cst_4 : f32 to vector<16x1xf32>
    %15 = arith.cmpf oeq, %4, %14 : vector<16x1xf32>
    %cst_5 = arith.constant 1.000000e+00 : f32
    %16 = vector.broadcast %cst_5 : f32 to vector<16x1xf32>
    %17 = arith.cmpf oeq, %4, %16 : vector<16x1xf32>
    %cst_6 = arith.constant 1.000000e+00 : f32
    %18 = vector.broadcast %cst_6 : f32 to vector<16x1xf32>
    %cst_7 = arith.constant 1.000000e+00 : f32
    %19 = vector.broadcast %cst_7 : f32 to vector<1x16xf32>
    %c0_8 = arith.constant 0 : index
    %c0_9 = arith.constant 0 : index
    %20 = vector.load %arg0[%c0_8, %c0_9] : memref<16x128xbf16, #tpu.memory_space<vmem>>, vector<16x128xbf16>
    %cst_10 = arith.constant 0.000000e+00 : f32
    %21 = vector.broadcast %cst_10 : f32 to vector<1x256xf32>
    %cst_11 = arith.constant 0.000000e+00 : f32
    %22 = vector.broadcast %cst_11 : f32 to vector<1x256xf32>
    %c0_12 = arith.constant 0 : index
    %c0_13 = arith.constant 0 : index
    %c0_14 = arith.constant 0 : index
    %23 = vector.load %arg3[%c0_12, %c0_13, %c0_14] : memref<3x128x256xbf16, #tpu.memory_space<vmem>>, vector<1x128x256xbf16>
    %24 = vector.shape_cast %23 : vector<1x128x256xbf16> to vector<128x256xbf16>
    %cst_15 = arith.constant dense<0.000000e+00> : vector<16x256xf32>
    %25 = tpu.matmul %20, %24, %cst_15 {dimension_numbers = #tpu.dot_dimension_numbers<[1], [0], [0], [1], [0, 0, 1, 1], [], []>} : vector<16x128xbf16>, vector<128x256xbf16>, vector<16x256xf32> -> vector<16x256xf32>
    %26 = vector.extract_strided_slice %25 {offsets = [0, 0], sizes = [16, 128], strides = [1, 1]} : vector<16x256xf32> to vector<16x128xf32>
    %27 = vector.extract_strided_slice %25 {offsets = [0, 128], sizes = [16, 128], strides = [1, 1]} : vector<16x256xf32> to vector<16x128xf32>
    %28 = arith.truncf %27 : vector<16x128xf32> to vector<16x128xbf16>
    %cst_16 = arith.constant dense<0.000000e+00> : vector<16x128xf32>
    %29 = tpu.matmul %3, %28, %cst_16 {dimension_numbers = #tpu.dot_dimension_numbers<[1], [0], [0], [1], [0, 0, 1, 1], [], []>} : vector<16x16xbf16>, vector<16x128xbf16>, vector<16x128xf32> -> vector<16x128xf32>
    %30 = arith.addf %26, %29 : vector<16x128xf32>
    %c0_17 = arith.constant 0 : index
    %c0_18 = arith.constant 0 : index
    %31 = vector.load %arg4[%c0_17, %c0_18] : memref<9x128xf32, #tpu.memory_space<vmem>>, vector<1x128xf32>
    %32 = vector.broadcast %31 : vector<1x128xf32> to vector<16x128xf32>
    %33 = arith.addf %30, %32 : vector<16x128xf32>
    %cst_19 = arith.constant 0.000000e+00 : f32
    %34 = vector.broadcast %cst_19 : f32 to vector<16x128xf32>
    %35 = arith.maximumf %33, %34 : vector<16x128xf32>
    %c3 = arith.constant 3 : index
    %c0_20 = arith.constant 0 : index
    %36 = vector.load %arg4[%c3, %c0_20] : memref<9x128xf32, #tpu.memory_space<vmem>>, vector<1x128xf32>
    %37 = vector.broadcast %36 : vector<1x128xf32> to vector<16x128xf32>
    %38 = arith.mulf %35, %37 : vector<16x128xf32>
    %cst_21 = arith.constant dense<0.000000e+00> : vector<16xf32>
    %39 = vector.multi_reduction <add>, %38, %cst_21 [1] : vector<16x128xf32> to vector<16xf32>
    %40 = vector.shape_cast %39 : vector<16xf32> to vector<16x1xf32>
    %41 = math.tanh %40 : vector<16x1xf32>
    %cst_22 = arith.constant 5.000000e-01 : f32
    %42 = vector.broadcast %cst_22 : f32 to vector<16x1xf32>
    %43 = arith.cmpf ogt, %18, %42 : vector<16x1xf32>
    %cst_23 = arith.constant 5.000000e-01 : f32
    %44 = vector.broadcast %cst_23 : f32 to vector<1x16xf32>
    %45 = arith.cmpf ogt, %19, %44 : vector<1x16xf32>
    %cst_24 = arith.constant -1.000000e+30 : f32
    %46 = vector.broadcast %cst_24 : f32 to vector<16x1xf32>
    %47 = arith.select %43, %41, %46 : vector<16x1xi1>, vector<16x1xf32>
    %cst_25 = arith.constant 0.000000e+00 : f32
    %48 = vector.shape_cast %47 : vector<16x1xf32> to vector<16x1xf32>
    %49 = vector.broadcast %48 : vector<16x1xf32> to vector<16x16xf32>
    %50 = vector.broadcast %cst_25 : f32 to vector<16x16xf32>
    %51 = arith.select %2, %49, %50 : vector<16x16xi1>, vector<16x16xf32>
    %cst_26 = arith.constant dense<0.000000e+00> : vector<16xf32>
    %52 = vector.multi_reduction <add>, %51, %cst_26 [0] : vector<16x16xf32> to vector<16xf32>
    %53 = vector.shape_cast %52 : vector<16xf32> to vector<1x16xf32>
    %54 = vector.broadcast %45 : vector<1x16xi1> to vector<16x16xi1>
    %55 = arith.andi %13, %54 : vector<16x16xi1>
    %cst_27 = arith.constant 1.000000e+00 : f32
    %cst_28 = arith.constant 0.000000e+00 : f32
    %56 = vector.broadcast %cst_27 : f32 to vector<16x16xf32>
    %57 = vector.broadcast %cst_28 : f32 to vector<16x16xf32>
    %58 = arith.select %55, %56, %57 : vector<16x16xi1>, vector<16x16xf32>
    %cst_29 = arith.constant dense<0.000000e+00> : vector<16xf32>
    %59 = vector.multi_reduction <add>, %58, %cst_29 [1] : vector<16x16xf32> to vector<16xf32>
    %60 = vector.shape_cast %59 : vector<16xf32> to vector<16x1xf32>
    %cst_30 = arith.constant 8.000000e-01 : f32
    %61 = vector.broadcast %cst_30 : f32 to vector<16x1xf32>
    %62 = arith.mulf %61, %60 : vector<16x1xf32>
    %63 = math.ceil %62 : vector<16x1xf32>
    %64 = vector.broadcast %53 : vector<1x16xf32> to vector<16x16xf32>
    %65 = vector.broadcast %47 : vector<16x1xf32> to vector<16x16xf32>
    %66 = arith.cmpf ogt, %64, %65 : vector<16x16xf32>
    %67 = vector.broadcast %53 : vector<1x16xf32> to vector<16x16xf32>
    %68 = vector.broadcast %47 : vector<16x1xf32> to vector<16x16xf32>
    %69 = arith.cmpf oeq, %67, %68 : vector<16x16xf32>
    %70 = arith.cmpi slt, %1, %0 : vector<16x16xi32>
    %71 = arith.andi %69, %70 : vector<16x16xi1>
    %72 = arith.ori %66, %71 : vector<16x16xi1>
    %73 = arith.andi %55, %72 : vector<16x16xi1>
    %cst_31 = arith.constant 1.000000e+00 : f32
    %cst_32 = arith.constant 0.000000e+00 : f32
    %74 = vector.broadcast %cst_31 : f32 to vector<16x16xf32>
    %75 = vector.broadcast %cst_32 : f32 to vector<16x16xf32>
    %76 = arith.select %73, %74, %75 : vector<16x16xi1>, vector<16x16xf32>
    %cst_33 = arith.constant dense<0.000000e+00> : vector<16xf32>
    %77 = vector.multi_reduction <add>, %76, %cst_33 [1] : vector<16x16xf32> to vector<16xf32>
    %78 = vector.shape_cast %77 : vector<16xf32> to vector<16x1xf32>
    %79 = arith.cmpf olt, %78, %63 : vector<16x1xf32>
    %80 = arith.andi %43, %79 : vector<16x1xi1>
    %81 = arith.extui %80 : vector<16x1xi1> to vector<16x1xi32>
    %82 = arith.sitofp %81 : vector<16x1xi32> to vector<16x1xf32>
    %cst_34 = arith.constant 0.000000e+00 : f32
    %83 = vector.shape_cast %82 : vector<16x1xf32> to vector<16x1xf32>
    %84 = vector.broadcast %83 : vector<16x1xf32> to vector<16x16xf32>
    %85 = vector.broadcast %cst_34 : f32 to vector<16x16xf32>
    %86 = arith.select %2, %84, %85 : vector<16x16xi1>, vector<16x16xf32>
    %cst_35 = arith.constant dense<0.000000e+00> : vector<16xf32>
    %87 = vector.multi_reduction <add>, %86, %cst_35 [0] : vector<16x16xf32> to vector<16xf32>
    %88 = vector.shape_cast %87 : vector<16xf32> to vector<1x16xf32>
    %89 = arith.mulf %41, %82 : vector<16x1xf32>
    %90 = vector.broadcast %89 : vector<16x1xf32> to vector<16x128xf32>
    %91 = arith.mulf %35, %90 : vector<16x128xf32>
    %92 = arith.truncf %91 : vector<16x128xf32> to vector<16x128xbf16>
    %93 = arith.andi %15, %80 : vector<16x1xi1>
    %94 = arith.extui %93 : vector<16x1xi1> to vector<16x1xi32>
    %95 = arith.sitofp %94 : vector<16x1xi32> to vector<16x1xf32>
    %96 = vector.shape_cast %95 : vector<16x1xf32> to vector<1x16x1xf32>
    %cst_36 = arith.constant dense<0.000000e+00> : vector<1xf32>
    %97 = vector.multi_reduction <add>, %96, %cst_36 [1, 2] : vector<1x16x1xf32> to vector<1xf32>
    %98 = vector.shape_cast %97 : vector<1xf32> to vector<1x1x1xf32>
    %99 = vector.extract %98[0, 0, 0] : f32 from vector<1x1x1xf32>
    %100 = vector.broadcast %99 : f32 to vector<1x1xf32>
    %101 = vector.broadcast %95 : vector<16x1xf32> to vector<16x128xf32>
    %102 = arith.mulf %91, %101 : vector<16x128xf32>
    %cst_37 = arith.constant dense<0.000000e+00> : vector<128xf32>
    %103 = vector.multi_reduction <add>, %102, %cst_37 [0] : vector<16x128xf32> to vector<128xf32>
    %104 = vector.shape_cast %103 : vector<128xf32> to vector<1x128xf32>
    %cst_38 = arith.constant 1.000000e+00 : f32
    %105 = vector.broadcast %cst_38 : f32 to vector<1x1xf32>
    %106 = arith.maximumf %100, %105 : vector<1x1xf32>
    %107 = vector.broadcast %106 : vector<1x1xf32> to vector<1x128xf32>
    %108 = arith.divf %104, %107 : vector<1x128xf32>
    %cst_39 = arith.constant -1.000000e+30 : f32
    %109 = vector.shape_cast %93 : vector<16x1xi1> to vector<16x1xi1>
    %110 = vector.broadcast %109 : vector<16x1xi1> to vector<16x128xi1>
    %111 = vector.broadcast %cst_39 : f32 to vector<16x128xf32>
    %112 = arith.select %110, %91, %111 : vector<16x128xi1>, vector<16x128xf32>
    %cst_40 = arith.constant dense<0xFF800000> : vector<128xf32>
    %113 = vector.multi_reduction <maximumf>, %112, %cst_40 [0] : vector<16x128xf32> to vector<128xf32>
    %114 = vector.shape_cast %113 : vector<128xf32> to vector<1x128xf32>
    %cst_41 = arith.constant 5.000000e-01 : f32
    %115 = vector.broadcast %cst_41 : f32 to vector<1x1xf32>
    %116 = arith.cmpf ogt, %100, %115 : vector<1x1xf32>
    %cst_42 = arith.constant 0.000000e+00 : f32
    %117 = vector.shape_cast %116 : vector<1x1xi1> to vector<1x1xi1>
    %118 = vector.broadcast %117 : vector<1x1xi1> to vector<1x128xi1>
    %119 = vector.broadcast %cst_42 : f32 to vector<1x128xf32>
    %120 = arith.select %118, %114, %119 : vector<1x128xi1>, vector<1x128xf32>
    %121 = tpu.concatenate %120, %108 in 1 : vector<1x128xf32>, vector<1x128xf32> -> vector<1x256xf32>
    %122 = arith.addf %21, %121 : vector<1x256xf32>
    %123 = arith.andi %17, %80 : vector<16x1xi1>
    %124 = arith.extui %123 : vector<16x1xi1> to vector<16x1xi32>
    %125 = arith.sitofp %124 : vector<16x1xi32> to vector<16x1xf32>
    %126 = vector.shape_cast %125 : vector<16x1xf32> to vector<1x16x1xf32>
    %cst_43 = arith.constant dense<0.000000e+00> : vector<1xf32>
    %127 = vector.multi_reduction <add>, %126, %cst_43 [1, 2] : vector<1x16x1xf32> to vector<1xf32>
    %128 = vector.shape_cast %127 : vector<1xf32> to vector<1x1x1xf32>
    %129 = vector.extract %128[0, 0, 0] : f32 from vector<1x1x1xf32>
    %130 = vector.broadcast %129 : f32 to vector<1x1xf32>
    %131 = vector.broadcast %125 : vector<16x1xf32> to vector<16x128xf32>
    %132 = arith.mulf %91, %131 : vector<16x128xf32>
    %cst_44 = arith.constant dense<0.000000e+00> : vector<128xf32>
    %133 = vector.multi_reduction <add>, %132, %cst_44 [0] : vector<16x128xf32> to vector<128xf32>
    %134 = vector.shape_cast %133 : vector<128xf32> to vector<1x128xf32>
    %cst_45 = arith.constant 1.000000e+00 : f32
    %135 = vector.broadcast %cst_45 : f32 to vector<1x1xf32>
    %136 = arith.maximumf %130, %135 : vector<1x1xf32>
    %137 = vector.broadcast %136 : vector<1x1xf32> to vector<1x128xf32>
    %138 = arith.divf %134, %137 : vector<1x128xf32>
    %cst_46 = arith.constant -1.000000e+30 : f32
    %139 = vector.shape_cast %123 : vector<16x1xi1> to vector<16x1xi1>
    %140 = vector.broadcast %139 : vector<16x1xi1> to vector<16x128xi1>
    %141 = vector.broadcast %cst_46 : f32 to vector<16x128xf32>
    %142 = arith.select %140, %91, %141 : vector<16x128xi1>, vector<16x128xf32>
    %cst_47 = arith.constant dense<0xFF800000> : vector<128xf32>
    %143 = vector.multi_reduction <maximumf>, %142, %cst_47 [0] : vector<16x128xf32> to vector<128xf32>
    %144 = vector.shape_cast %143 : vector<128xf32> to vector<1x128xf32>
    %cst_48 = arith.constant 5.000000e-01 : f32
    %145 = vector.broadcast %cst_48 : f32 to vector<1x1xf32>
    %146 = arith.cmpf ogt, %130, %145 : vector<1x1xf32>
    %cst_49 = arith.constant 0.000000e+00 : f32
    %147 = vector.shape_cast %146 : vector<1x1xi1> to vector<1x1xi1>
    %148 = vector.broadcast %147 : vector<1x1xi1> to vector<1x128xi1>
    %149 = vector.broadcast %cst_49 : f32 to vector<1x128xf32>
    %150 = arith.select %148, %144, %149 : vector<1x128xi1>, vector<1x128xf32>
    %151 = tpu.concatenate %150, %138 in 1 : vector<1x128xf32>, vector<1x128xf32> -> vector<1x256xf32>
    %152 = arith.addf %22, %151 : vector<1x256xf32>
    %c1 = arith.constant 1 : index
    %c0_50 = arith.constant 0 : index
    %c0_51 = arith.constant 0 : index
    %153 = vector.load %arg3[%c1, %c0_50, %c0_51] : memref<3x128x256xbf16, #tpu.memory_space<vmem>>, vector<1x128x256xbf16>
    %154 = vector.shape_cast %153 : vector<1x128x256xbf16> to vector<128x256xbf16>
    %cst_52 = arith.constant dense<0.000000e+00> : vector<16x256xf32>
    %155 = tpu.matmul %92, %154, %cst_52 {dimension_numbers = #tpu.dot_dimension_numbers<[1], [0], [0], [1], [0, 0, 1, 1], [], []>} : vector<16x128xbf16>, vector<128x256xbf16>, vector<16x256xf32> -> vector<16x256xf32>
    %156 = vector.extract_strided_slice %155 {offsets = [0, 0], sizes = [16, 128], strides = [1, 1]} : vector<16x256xf32> to vector<16x128xf32>
    %157 = vector.extract_strided_slice %155 {offsets = [0, 128], sizes = [16, 128], strides = [1, 1]} : vector<16x256xf32> to vector<16x128xf32>
    %158 = arith.truncf %157 : vector<16x128xf32> to vector<16x128xbf16>
    %cst_53 = arith.constant dense<0.000000e+00> : vector<16x128xf32>
    %159 = tpu.matmul %3, %158, %cst_53 {dimension_numbers = #tpu.dot_dimension_numbers<[1], [0], [0], [1], [0, 0, 1, 1], [], []>} : vector<16x16xbf16>, vector<16x128xbf16>, vector<16x128xf32> -> vector<16x128xf32>
    %160 = arith.addf %156, %159 : vector<16x128xf32>
    %c1_54 = arith.constant 1 : index
    %c0_55 = arith.constant 0 : index
    %161 = vector.load %arg4[%c1_54, %c0_55] : memref<9x128xf32, #tpu.memory_space<vmem>>, vector<1x128xf32>
    %162 = vector.broadcast %161 : vector<1x128xf32> to vector<16x128xf32>
    %163 = arith.addf %160, %162 : vector<16x128xf32>
    %cst_56 = arith.constant 0.000000e+00 : f32
    %164 = vector.broadcast %cst_56 : f32 to vector<16x128xf32>
    %165 = arith.maximumf %163, %164 : vector<16x128xf32>
    %c4 = arith.constant 4 : index
    %c0_57 = arith.constant 0 : index
    %166 = vector.load %arg4[%c4, %c0_57] : memref<9x128xf32, #tpu.memory_space<vmem>>, vector<1x128xf32>
    %167 = vector.broadcast %166 : vector<1x128xf32> to vector<16x128xf32>
    %168 = arith.mulf %165, %167 : vector<16x128xf32>
    %cst_58 = arith.constant dense<0.000000e+00> : vector<16xf32>
    %169 = vector.multi_reduction <add>, %168, %cst_58 [1] : vector<16x128xf32> to vector<16xf32>
    %170 = vector.shape_cast %169 : vector<16xf32> to vector<16x1xf32>
    %171 = math.tanh %170 : vector<16x1xf32>
    %cst_59 = arith.constant 5.000000e-01 : f32
    %172 = vector.broadcast %cst_59 : f32 to vector<16x1xf32>
    %173 = arith.cmpf ogt, %82, %172 : vector<16x1xf32>
    %cst_60 = arith.constant 5.000000e-01 : f32
    %174 = vector.broadcast %cst_60 : f32 to vector<1x16xf32>
    %175 = arith.cmpf ogt, %88, %174 : vector<1x16xf32>
    %cst_61 = arith.constant -1.000000e+30 : f32
    %176 = vector.broadcast %cst_61 : f32 to vector<16x1xf32>
    %177 = arith.select %173, %171, %176 : vector<16x1xi1>, vector<16x1xf32>
    %cst_62 = arith.constant 0.000000e+00 : f32
    %178 = vector.shape_cast %177 : vector<16x1xf32> to vector<16x1xf32>
    %179 = vector.broadcast %178 : vector<16x1xf32> to vector<16x16xf32>
    %180 = vector.broadcast %cst_62 : f32 to vector<16x16xf32>
    %181 = arith.select %2, %179, %180 : vector<16x16xi1>, vector<16x16xf32>
    %cst_63 = arith.constant dense<0.000000e+00> : vector<16xf32>
    %182 = vector.multi_reduction <add>, %181, %cst_63 [0] : vector<16x16xf32> to vector<16xf32>
    %183 = vector.shape_cast %182 : vector<16xf32> to vector<1x16xf32>
    %184 = vector.broadcast %175 : vector<1x16xi1> to vector<16x16xi1>
    %185 = arith.andi %13, %184 : vector<16x16xi1>
    %cst_64 = arith.constant 1.000000e+00 : f32
    %cst_65 = arith.constant 0.000000e+00 : f32
    %186 = vector.broadcast %cst_64 : f32 to vector<16x16xf32>
    %187 = vector.broadcast %cst_65 : f32 to vector<16x16xf32>
    %188 = arith.select %185, %186, %187 : vector<16x16xi1>, vector<16x16xf32>
    %cst_66 = arith.constant dense<0.000000e+00> : vector<16xf32>
    %189 = vector.multi_reduction <add>, %188, %cst_66 [1] : vector<16x16xf32> to vector<16xf32>
    %190 = vector.shape_cast %189 : vector<16xf32> to vector<16x1xf32>
    %cst_67 = arith.constant 8.000000e-01 : f32
    %191 = vector.broadcast %cst_67 : f32 to vector<16x1xf32>
    %192 = arith.mulf %191, %190 : vector<16x1xf32>
    %193 = math.ceil %192 : vector<16x1xf32>
    %194 = vector.broadcast %183 : vector<1x16xf32> to vector<16x16xf32>
    %195 = vector.broadcast %177 : vector<16x1xf32> to vector<16x16xf32>
    %196 = arith.cmpf ogt, %194, %195 : vector<16x16xf32>
    %197 = vector.broadcast %183 : vector<1x16xf32> to vector<16x16xf32>
    %198 = vector.broadcast %177 : vector<16x1xf32> to vector<16x16xf32>
    %199 = arith.cmpf oeq, %197, %198 : vector<16x16xf32>
    %200 = arith.cmpi slt, %1, %0 : vector<16x16xi32>
    %201 = arith.andi %199, %200 : vector<16x16xi1>
    %202 = arith.ori %196, %201 : vector<16x16xi1>
    %203 = arith.andi %185, %202 : vector<16x16xi1>
    %cst_68 = arith.constant 1.000000e+00 : f32
    %cst_69 = arith.constant 0.000000e+00 : f32
    %204 = vector.broadcast %cst_68 : f32 to vector<16x16xf32>
    %205 = vector.broadcast %cst_69 : f32 to vector<16x16xf32>
    %206 = arith.select %203, %204, %205 : vector<16x16xi1>, vector<16x16xf32>
    %cst_70 = arith.constant dense<0.000000e+00> : vector<16xf32>
    %207 = vector.multi_reduction <add>, %206, %cst_70 [1] : vector<16x16xf32> to vector<16xf32>
    %208 = vector.shape_cast %207 : vector<16xf32> to vector<16x1xf32>
    %209 = arith.cmpf olt, %208, %193 : vector<16x1xf32>
    %210 = arith.andi %173, %209 : vector<16x1xi1>
    %211 = arith.extui %210 : vector<16x1xi1> to vector<16x1xi32>
    %212 = arith.sitofp %211 : vector<16x1xi32> to vector<16x1xf32>
    %cst_71 = arith.constant 0.000000e+00 : f32
    %213 = vector.shape_cast %212 : vector<16x1xf32> to vector<16x1xf32>
    %214 = vector.broadcast %213 : vector<16x1xf32> to vector<16x16xf32>
    %215 = vector.broadcast %cst_71 : f32 to vector<16x16xf32>
    %216 = arith.select %2, %214, %215 : vector<16x16xi1>, vector<16x16xf32>
    %cst_72 = arith.constant dense<0.000000e+00> : vector<16xf32>
    %217 = vector.multi_reduction <add>, %216, %cst_72 [0] : vector<16x16xf32> to vector<16xf32>
    %218 = vector.shape_cast %217 : vector<16xf32> to vector<1x16xf32>
    %219 = arith.mulf %171, %212 : vector<16x1xf32>
    %220 = vector.broadcast %219 : vector<16x1xf32> to vector<16x128xf32>
    %221 = arith.mulf %165, %220 : vector<16x128xf32>
    %222 = arith.truncf %221 : vector<16x128xf32> to vector<16x128xbf16>
    %223 = arith.andi %15, %210 : vector<16x1xi1>
    %224 = arith.extui %223 : vector<16x1xi1> to vector<16x1xi32>
    %225 = arith.sitofp %224 : vector<16x1xi32> to vector<16x1xf32>
    %226 = vector.shape_cast %225 : vector<16x1xf32> to vector<1x16x1xf32>
    %cst_73 = arith.constant dense<0.000000e+00> : vector<1xf32>
    %227 = vector.multi_reduction <add>, %226, %cst_73 [1, 2] : vector<1x16x1xf32> to vector<1xf32>
    %228 = vector.shape_cast %227 : vector<1xf32> to vector<1x1x1xf32>
    %229 = vector.extract %228[0, 0, 0] : f32 from vector<1x1x1xf32>
    %230 = vector.broadcast %229 : f32 to vector<1x1xf32>
    %231 = vector.broadcast %225 : vector<16x1xf32> to vector<16x128xf32>
    %232 = arith.mulf %221, %231 : vector<16x128xf32>
    %cst_74 = arith.constant dense<0.000000e+00> : vector<128xf32>
    %233 = vector.multi_reduction <add>, %232, %cst_74 [0] : vector<16x128xf32> to vector<128xf32>
    %234 = vector.shape_cast %233 : vector<128xf32> to vector<1x128xf32>
    %cst_75 = arith.constant 1.000000e+00 : f32
    %235 = vector.broadcast %cst_75 : f32 to vector<1x1xf32>
    %236 = arith.maximumf %230, %235 : vector<1x1xf32>
    %237 = vector.broadcast %236 : vector<1x1xf32> to vector<1x128xf32>
    %238 = arith.divf %234, %237 : vector<1x128xf32>
    %cst_76 = arith.constant -1.000000e+30 : f32
    %239 = vector.shape_cast %223 : vector<16x1xi1> to vector<16x1xi1>
    %240 = vector.broadcast %239 : vector<16x1xi1> to vector<16x128xi1>
    %241 = vector.broadcast %cst_76 : f32 to vector<16x128xf32>
    %242 = arith.select %240, %221, %241 : vector<16x128xi1>, vector<16x128xf32>
    %cst_77 = arith.constant dense<0xFF800000> : vector<128xf32>
    %243 = vector.multi_reduction <maximumf>, %242, %cst_77 [0] : vector<16x128xf32> to vector<128xf32>
    %244 = vector.shape_cast %243 : vector<128xf32> to vector<1x128xf32>
    %cst_78 = arith.constant 5.000000e-01 : f32
    %245 = vector.broadcast %cst_78 : f32 to vector<1x1xf32>
    %246 = arith.cmpf ogt, %230, %245 : vector<1x1xf32>
    %cst_79 = arith.constant 0.000000e+00 : f32
    %247 = vector.shape_cast %246 : vector<1x1xi1> to vector<1x1xi1>
    %248 = vector.broadcast %247 : vector<1x1xi1> to vector<1x128xi1>
    %249 = vector.broadcast %cst_79 : f32 to vector<1x128xf32>
    %250 = arith.select %248, %244, %249 : vector<1x128xi1>, vector<1x128xf32>
    %251 = tpu.concatenate %250, %238 in 1 : vector<1x128xf32>, vector<1x128xf32> -> vector<1x256xf32>
    %252 = arith.addf %122, %251 : vector<1x256xf32>
    %253 = arith.andi %17, %210 : vector<16x1xi1>
    %254 = arith.extui %253 : vector<16x1xi1> to vector<16x1xi32>
    %255 = arith.sitofp %254 : vector<16x1xi32> to vector<16x1xf32>
    %256 = vector.shape_cast %255 : vector<16x1xf32> to vector<1x16x1xf32>
    %cst_80 = arith.constant dense<0.000000e+00> : vector<1xf32>
    %257 = vector.multi_reduction <add>, %256, %cst_80 [1, 2] : vector<1x16x1xf32> to vector<1xf32>
    %258 = vector.shape_cast %257 : vector<1xf32> to vector<1x1x1xf32>
    %259 = vector.extract %258[0, 0, 0] : f32 from vector<1x1x1xf32>
    %260 = vector.broadcast %259 : f32 to vector<1x1xf32>
    %261 = vector.broadcast %255 : vector<16x1xf32> to vector<16x128xf32>
    %262 = arith.mulf %221, %261 : vector<16x128xf32>
    %cst_81 = arith.constant dense<0.000000e+00> : vector<128xf32>
    %263 = vector.multi_reduction <add>, %262, %cst_81 [0] : vector<16x128xf32> to vector<128xf32>
    %264 = vector.shape_cast %263 : vector<128xf32> to vector<1x128xf32>
    %cst_82 = arith.constant 1.000000e+00 : f32
    %265 = vector.broadcast %cst_82 : f32 to vector<1x1xf32>
    %266 = arith.maximumf %260, %265 : vector<1x1xf32>
    %267 = vector.broadcast %266 : vector<1x1xf32> to vector<1x128xf32>
    %268 = arith.divf %264, %267 : vector<1x128xf32>
    %cst_83 = arith.constant -1.000000e+30 : f32
    %269 = vector.shape_cast %253 : vector<16x1xi1> to vector<16x1xi1>
    %270 = vector.broadcast %269 : vector<16x1xi1> to vector<16x128xi1>
    %271 = vector.broadcast %cst_83 : f32 to vector<16x128xf32>
    %272 = arith.select %270, %221, %271 : vector<16x128xi1>, vector<16x128xf32>
    %cst_84 = arith.constant dense<0xFF800000> : vector<128xf32>
    %273 = vector.multi_reduction <maximumf>, %272, %cst_84 [0] : vector<16x128xf32> to vector<128xf32>
    %274 = vector.shape_cast %273 : vector<128xf32> to vector<1x128xf32>
    %cst_85 = arith.constant 5.000000e-01 : f32
    %275 = vector.broadcast %cst_85 : f32 to vector<1x1xf32>
    %276 = arith.cmpf ogt, %260, %275 : vector<1x1xf32>
    %cst_86 = arith.constant 0.000000e+00 : f32
    %277 = vector.shape_cast %276 : vector<1x1xi1> to vector<1x1xi1>
    %278 = vector.broadcast %277 : vector<1x1xi1> to vector<1x128xi1>
    %279 = vector.broadcast %cst_86 : f32 to vector<1x128xf32>
    %280 = arith.select %278, %274, %279 : vector<1x128xi1>, vector<1x128xf32>
    %281 = tpu.concatenate %280, %268 in 1 : vector<1x128xf32>, vector<1x128xf32> -> vector<1x256xf32>
    %282 = arith.addf %152, %281 : vector<1x256xf32>
    %c2 = arith.constant 2 : index
    %c0_87 = arith.constant 0 : index
    %c0_88 = arith.constant 0 : index
    %283 = vector.load %arg3[%c2, %c0_87, %c0_88] : memref<3x128x256xbf16, #tpu.memory_space<vmem>>, vector<1x128x256xbf16>
    %284 = vector.shape_cast %283 : vector<1x128x256xbf16> to vector<128x256xbf16>
    %cst_89 = arith.constant dense<0.000000e+00> : vector<16x256xf32>
    %285 = tpu.matmul %222, %284, %cst_89 {dimension_numbers = #tpu.dot_dimension_numbers<[1], [0], [0], [1], [0, 0, 1, 1], [], []>} : vector<16x128xbf16>, vector<128x256xbf16>, vector<16x256xf32> -> vector<16x256xf32>
    %286 = vector.extract_strided_slice %285 {offsets = [0, 0], sizes = [16, 128], strides = [1, 1]} : vector<16x256xf32> to vector<16x128xf32>
    %287 = vector.extract_strided_slice %285 {offsets = [0, 128], sizes = [16, 128], strides = [1, 1]} : vector<16x256xf32> to vector<16x128xf32>
    %288 = arith.truncf %287 : vector<16x128xf32> to vector<16x128xbf16>
    %cst_90 = arith.constant dense<0.000000e+00> : vector<16x128xf32>
    %289 = tpu.matmul %3, %288, %cst_90 {dimension_numbers = #tpu.dot_dimension_numbers<[1], [0], [0], [1], [0, 0, 1, 1], [], []>} : vector<16x16xbf16>, vector<16x128xbf16>, vector<16x128xf32> -> vector<16x128xf32>
    %290 = arith.addf %286, %289 : vector<16x128xf32>
    %c2_91 = arith.constant 2 : index
    %c0_92 = arith.constant 0 : index
    %291 = vector.load %arg4[%c2_91, %c0_92] : memref<9x128xf32, #tpu.memory_space<vmem>>, vector<1x128xf32>
    %292 = vector.broadcast %291 : vector<1x128xf32> to vector<16x128xf32>
    %293 = arith.addf %290, %292 : vector<16x128xf32>
    %cst_93 = arith.constant 0.000000e+00 : f32
    %294 = vector.broadcast %cst_93 : f32 to vector<16x128xf32>
    %295 = arith.maximumf %293, %294 : vector<16x128xf32>
    %c5 = arith.constant 5 : index
    %c0_94 = arith.constant 0 : index
    %296 = vector.load %arg4[%c5, %c0_94] : memref<9x128xf32, #tpu.memory_space<vmem>>, vector<1x128xf32>
    %297 = vector.broadcast %296 : vector<1x128xf32> to vector<16x128xf32>
    %298 = arith.mulf %295, %297 : vector<16x128xf32>
    %cst_95 = arith.constant dense<0.000000e+00> : vector<16xf32>
    %299 = vector.multi_reduction <add>, %298, %cst_95 [1] : vector<16x128xf32> to vector<16xf32>
    %300 = vector.shape_cast %299 : vector<16xf32> to vector<16x1xf32>
    %301 = math.tanh %300 : vector<16x1xf32>
    %cst_96 = arith.constant 5.000000e-01 : f32
    %302 = vector.broadcast %cst_96 : f32 to vector<16x1xf32>
    %303 = arith.cmpf ogt, %212, %302 : vector<16x1xf32>
    %cst_97 = arith.constant 5.000000e-01 : f32
    %304 = vector.broadcast %cst_97 : f32 to vector<1x16xf32>
    %305 = arith.cmpf ogt, %218, %304 : vector<1x16xf32>
    %cst_98 = arith.constant -1.000000e+30 : f32
    %306 = vector.broadcast %cst_98 : f32 to vector<16x1xf32>
    %307 = arith.select %303, %301, %306 : vector<16x1xi1>, vector<16x1xf32>
    %cst_99 = arith.constant 0.000000e+00 : f32
    %308 = vector.shape_cast %307 : vector<16x1xf32> to vector<16x1xf32>
    %309 = vector.broadcast %308 : vector<16x1xf32> to vector<16x16xf32>
    %310 = vector.broadcast %cst_99 : f32 to vector<16x16xf32>
    %311 = arith.select %2, %309, %310 : vector<16x16xi1>, vector<16x16xf32>
    %cst_100 = arith.constant dense<0.000000e+00> : vector<16xf32>
    %312 = vector.multi_reduction <add>, %311, %cst_100 [0] : vector<16x16xf32> to vector<16xf32>
    %313 = vector.shape_cast %312 : vector<16xf32> to vector<1x16xf32>
    %314 = vector.broadcast %305 : vector<1x16xi1> to vector<16x16xi1>
    %315 = arith.andi %13, %314 : vector<16x16xi1>
    %cst_101 = arith.constant 1.000000e+00 : f32
    %cst_102 = arith.constant 0.000000e+00 : f32
    %316 = vector.broadcast %cst_101 : f32 to vector<16x16xf32>
    %317 = vector.broadcast %cst_102 : f32 to vector<16x16xf32>
    %318 = arith.select %315, %316, %317 : vector<16x16xi1>, vector<16x16xf32>
    %cst_103 = arith.constant dense<0.000000e+00> : vector<16xf32>
    %319 = vector.multi_reduction <add>, %318, %cst_103 [1] : vector<16x16xf32> to vector<16xf32>
    %320 = vector.shape_cast %319 : vector<16xf32> to vector<16x1xf32>
    %cst_104 = arith.constant 8.000000e-01 : f32
    %321 = vector.broadcast %cst_104 : f32 to vector<16x1xf32>
    %322 = arith.mulf %321, %320 : vector<16x1xf32>
    %323 = math.ceil %322 : vector<16x1xf32>
    %324 = vector.broadcast %313 : vector<1x16xf32> to vector<16x16xf32>
    %325 = vector.broadcast %307 : vector<16x1xf32> to vector<16x16xf32>
    %326 = arith.cmpf ogt, %324, %325 : vector<16x16xf32>
    %327 = vector.broadcast %313 : vector<1x16xf32> to vector<16x16xf32>
    %328 = vector.broadcast %307 : vector<16x1xf32> to vector<16x16xf32>
    %329 = arith.cmpf oeq, %327, %328 : vector<16x16xf32>
    %330 = arith.cmpi slt, %1, %0 : vector<16x16xi32>
    %331 = arith.andi %329, %330 : vector<16x16xi1>
    %332 = arith.ori %326, %331 : vector<16x16xi1>
    %333 = arith.andi %315, %332 : vector<16x16xi1>
    %cst_105 = arith.constant 1.000000e+00 : f32
    %cst_106 = arith.constant 0.000000e+00 : f32
    %334 = vector.broadcast %cst_105 : f32 to vector<16x16xf32>
    %335 = vector.broadcast %cst_106 : f32 to vector<16x16xf32>
    %336 = arith.select %333, %334, %335 : vector<16x16xi1>, vector<16x16xf32>
    %cst_107 = arith.constant dense<0.000000e+00> : vector<16xf32>
    %337 = vector.multi_reduction <add>, %336, %cst_107 [1] : vector<16x16xf32> to vector<16xf32>
    %338 = vector.shape_cast %337 : vector<16xf32> to vector<16x1xf32>
    %339 = arith.cmpf olt, %338, %323 : vector<16x1xf32>
    %340 = arith.andi %303, %339 : vector<16x1xi1>
    %341 = arith.extui %340 : vector<16x1xi1> to vector<16x1xi32>
    %342 = arith.sitofp %341 : vector<16x1xi32> to vector<16x1xf32>
    %343 = arith.mulf %301, %342 : vector<16x1xf32>
    %344 = vector.broadcast %343 : vector<16x1xf32> to vector<16x128xf32>
    %345 = arith.mulf %295, %344 : vector<16x128xf32>
    %346 = arith.andi %15, %340 : vector<16x1xi1>
    %347 = arith.extui %346 : vector<16x1xi1> to vector<16x1xi32>
    %348 = arith.sitofp %347 : vector<16x1xi32> to vector<16x1xf32>
    %349 = vector.shape_cast %348 : vector<16x1xf32> to vector<1x16x1xf32>
    %cst_108 = arith.constant dense<0.000000e+00> : vector<1xf32>
    %350 = vector.multi_reduction <add>, %349, %cst_108 [1, 2] : vector<1x16x1xf32> to vector<1xf32>
    %351 = vector.shape_cast %350 : vector<1xf32> to vector<1x1x1xf32>
    %352 = vector.extract %351[0, 0, 0] : f32 from vector<1x1x1xf32>
    %353 = vector.broadcast %352 : f32 to vector<1x1xf32>
    %354 = vector.broadcast %348 : vector<16x1xf32> to vector<16x128xf32>
    %355 = arith.mulf %345, %354 : vector<16x128xf32>
    %cst_109 = arith.constant dense<0.000000e+00> : vector<128xf32>
    %356 = vector.multi_reduction <add>, %355, %cst_109 [0] : vector<16x128xf32> to vector<128xf32>
    %357 = vector.shape_cast %356 : vector<128xf32> to vector<1x128xf32>
    %cst_110 = arith.constant 1.000000e+00 : f32
    %358 = vector.broadcast %cst_110 : f32 to vector<1x1xf32>
    %359 = arith.maximumf %353, %358 : vector<1x1xf32>
    %360 = vector.broadcast %359 : vector<1x1xf32> to vector<1x128xf32>
    %361 = arith.divf %357, %360 : vector<1x128xf32>
    %cst_111 = arith.constant -1.000000e+30 : f32
    %362 = vector.shape_cast %346 : vector<16x1xi1> to vector<16x1xi1>
    %363 = vector.broadcast %362 : vector<16x1xi1> to vector<16x128xi1>
    %364 = vector.broadcast %cst_111 : f32 to vector<16x128xf32>
    %365 = arith.select %363, %345, %364 : vector<16x128xi1>, vector<16x128xf32>
    %cst_112 = arith.constant dense<0xFF800000> : vector<128xf32>
    %366 = vector.multi_reduction <maximumf>, %365, %cst_112 [0] : vector<16x128xf32> to vector<128xf32>
    %367 = vector.shape_cast %366 : vector<128xf32> to vector<1x128xf32>
    %cst_113 = arith.constant 5.000000e-01 : f32
    %368 = vector.broadcast %cst_113 : f32 to vector<1x1xf32>
    %369 = arith.cmpf ogt, %353, %368 : vector<1x1xf32>
    %cst_114 = arith.constant 0.000000e+00 : f32
    %370 = vector.shape_cast %369 : vector<1x1xi1> to vector<1x1xi1>
    %371 = vector.broadcast %370 : vector<1x1xi1> to vector<1x128xi1>
    %372 = vector.broadcast %cst_114 : f32 to vector<1x128xf32>
    %373 = arith.select %371, %367, %372 : vector<1x128xi1>, vector<1x128xf32>
    %374 = tpu.concatenate %373, %361 in 1 : vector<1x128xf32>, vector<1x128xf32> -> vector<1x256xf32>
    %375 = arith.addf %252, %374 : vector<1x256xf32>
    %376 = arith.andi %17, %340 : vector<16x1xi1>
    %377 = arith.extui %376 : vector<16x1xi1> to vector<16x1xi32>
    %378 = arith.sitofp %377 : vector<16x1xi32> to vector<16x1xf32>
    %379 = vector.shape_cast %378 : vector<16x1xf32> to vector<1x16x1xf32>
    %cst_115 = arith.constant dense<0.000000e+00> : vector<1xf32>
    %380 = vector.multi_reduction <add>, %379, %cst_115 [1, 2] : vector<1x16x1xf32> to vector<1xf32>
    %381 = vector.shape_cast %380 : vector<1xf32> to vector<1x1x1xf32>
    %382 = vector.extract %381[0, 0, 0] : f32 from vector<1x1x1xf32>
    %383 = vector.broadcast %382 : f32 to vector<1x1xf32>
    %384 = vector.broadcast %378 : vector<16x1xf32> to vector<16x128xf32>
    %385 = arith.mulf %345, %384 : vector<16x128xf32>
    %cst_116 = arith.constant dense<0.000000e+00> : vector<128xf32>
    %386 = vector.multi_reduction <add>, %385, %cst_116 [0] : vector<16x128xf32> to vector<128xf32>
    %387 = vector.shape_cast %386 : vector<128xf32> to vector<1x128xf32>
    %cst_117 = arith.constant 1.000000e+00 : f32
    %388 = vector.broadcast %cst_117 : f32 to vector<1x1xf32>
    %389 = arith.maximumf %383, %388 : vector<1x1xf32>
    %390 = vector.broadcast %389 : vector<1x1xf32> to vector<1x128xf32>
    %391 = arith.divf %387, %390 : vector<1x128xf32>
    %cst_118 = arith.constant -1.000000e+30 : f32
    %392 = vector.shape_cast %376 : vector<16x1xi1> to vector<16x1xi1>
    %393 = vector.broadcast %392 : vector<16x1xi1> to vector<16x128xi1>
    %394 = vector.broadcast %cst_118 : f32 to vector<16x128xf32>
    %395 = arith.select %393, %345, %394 : vector<16x128xi1>, vector<16x128xf32>
    %cst_119 = arith.constant dense<0xFF800000> : vector<128xf32>
    %396 = vector.multi_reduction <maximumf>, %395, %cst_119 [0] : vector<16x128xf32> to vector<128xf32>
    %397 = vector.shape_cast %396 : vector<128xf32> to vector<1x128xf32>
    %cst_120 = arith.constant 5.000000e-01 : f32
    %398 = vector.broadcast %cst_120 : f32 to vector<1x1xf32>
    %399 = arith.cmpf ogt, %383, %398 : vector<1x1xf32>
    %cst_121 = arith.constant 0.000000e+00 : f32
    %400 = vector.shape_cast %399 : vector<1x1xi1> to vector<1x1xi1>
    %401 = vector.broadcast %400 : vector<1x1xi1> to vector<1x128xi1>
    %402 = vector.broadcast %cst_121 : f32 to vector<1x128xf32>
    %403 = arith.select %401, %397, %402 : vector<1x128xi1>, vector<1x128xf32>
    %404 = tpu.concatenate %403, %391 in 1 : vector<1x128xf32>, vector<1x128xf32> -> vector<1x256xf32>
    %405 = arith.addf %282, %404 : vector<1x256xf32>
    %406 = tpu.concatenate %375, %405 in 0 : vector<1x256xf32>, vector<1x256xf32> -> vector<2x256xf32>
    %c6 = arith.constant 6 : index
    %c0_122 = arith.constant 0 : index
    %407 = vector.load %arg4[%c6, %c0_122] : memref<9x128xf32, #tpu.memory_space<vmem>>, vector<1x128xf32>
    %c7 = arith.constant 7 : index
    %c0_123 = arith.constant 0 : index
    %408 = vector.load %arg4[%c7, %c0_123] : memref<9x128xf32, #tpu.memory_space<vmem>>, vector<1x128xf32>
    %c8 = arith.constant 8 : index
    %c0_124 = arith.constant 0 : index
    %409 = vector.load %arg4[%c8, %c0_124] : memref<9x128xf32, #tpu.memory_space<vmem>>, vector<1x128xf32>
    %410 = arith.truncf %406 : vector<2x256xf32> to vector<2x256xbf16>
    %c0_125 = arith.constant 0 : index
    %c0_126 = arith.constant 0 : index
    %411 = vector.load %arg5[%c0_125, %c0_126] : memref<256x128xbf16, #tpu.memory_space<vmem>>, vector<256x128xbf16>
    %cst_127 = arith.constant dense<0.000000e+00> : vector<2x128xf32>
    %412 = tpu.matmul %410, %411, %cst_127 {dimension_numbers = #tpu.dot_dimension_numbers<[1], [0], [0], [1], [0, 0, 1, 1], [], []>} : vector<2x256xbf16>, vector<256x128xbf16>, vector<2x128xf32> -> vector<2x128xf32>
    %413 = vector.broadcast %407 : vector<1x128xf32> to vector<2x128xf32>
    %414 = arith.addf %412, %413 : vector<2x128xf32>
    %cst_128 = arith.constant 0.000000e+00 : f32
    %415 = vector.broadcast %cst_128 : f32 to vector<2x128xf32>
    %416 = arith.maximumf %414, %415 : vector<2x128xf32>
    %417 = arith.truncf %416 : vector<2x128xf32> to vector<2x128xbf16>
    %c0_129 = arith.constant 0 : index
    %c0_130 = arith.constant 0 : index
    %c0_131 = arith.constant 0 : index
    %418 = vector.load %arg6[%c0_129, %c0_130, %c0_131] : memref<2x128x128xbf16, #tpu.memory_space<vmem>>, vector<1x128x128xbf16>
    %419 = vector.shape_cast %418 : vector<1x128x128xbf16> to vector<128x128xbf16>
    %cst_132 = arith.constant dense<0.000000e+00> : vector<2x128xf32>
    %420 = tpu.matmul %417, %419, %cst_132 {dimension_numbers = #tpu.dot_dimension_numbers<[1], [0], [0], [1], [0, 0, 1, 1], [], []>} : vector<2x128xbf16>, vector<128x128xbf16>, vector<2x128xf32> -> vector<2x128xf32>
    %421 = vector.broadcast %408 : vector<1x128xf32> to vector<2x128xf32>
    %422 = arith.addf %420, %421 : vector<2x128xf32>
    %cst_133 = arith.constant 0.000000e+00 : f32
    %423 = vector.broadcast %cst_133 : f32 to vector<2x128xf32>
    %424 = arith.maximumf %422, %423 : vector<2x128xf32>
    %425 = arith.truncf %424 : vector<2x128xf32> to vector<2x128xbf16>
    %c1_134 = arith.constant 1 : index
    %c0_135 = arith.constant 0 : index
    %c0_136 = arith.constant 0 : index
    %426 = vector.load %arg6[%c1_134, %c0_135, %c0_136] : memref<2x128x128xbf16, #tpu.memory_space<vmem>>, vector<1x128x128xbf16>
    %427 = vector.shape_cast %426 : vector<1x128x128xbf16> to vector<128x128xbf16>
    %cst_137 = arith.constant dense<0.000000e+00> : vector<2x128xf32>
    %428 = tpu.matmul %425, %427, %cst_137 {dimension_numbers = #tpu.dot_dimension_numbers<[1], [0], [0], [1], [0, 0, 1, 1], [], []>} : vector<2x128xbf16>, vector<128x128xbf16>, vector<2x128xf32> -> vector<2x128xf32>
    %429 = vector.broadcast %409 : vector<1x128xf32> to vector<2x128xf32>
    %430 = arith.addf %428, %429 : vector<2x128xf32>
    %c0_138 = arith.constant 0 : index
    %c0_139 = arith.constant 0 : index
    %431 = vector.load %arg7[%c0_138, %c0_139] : memref<2x128xf32, #tpu.memory_space<vmem>>, vector<2x128xf32>
    tpu.vector_store %arg7[%c0_138, %c0_139], %430 {strides = array<i32>} : memref<2x128xf32, #tpu.memory_space<vmem>>, vector<2x128xf32>,
    return
  }
}

</mosaic_0001>

<bundles_post_ra>
// kernel: net_forward.1
= control target key start
LH: loop header
LB: loop body
LE: loop exit
PB: predicated region body
PF: predicated region fallthrough
CT: control target
= control target key end

     0   :  { %12 = vsyncpa [#allocation3], 0  ;;  %s3020_s0 = inlined_call_operand.vmem [shape: bf16[16,128], index: 0, kind: input, shape index: {}]   ;;  %s3021_s1 = inlined_call_operand.vmem [shape: bf16[16,16], index: 1, kind: input, shape index: {}]   ;;  %s3022_s2 = inlined_call_operand.vmem [shape: f32[16,1], index: 2, kind: input, shape index: {}]   ;;  %s3023_s3 = inlined_call_operand.hbm [shape: bf16[3,128,256], index: 3, kind: input, shape index: {}]   ;;  %s3024_s4 = inlined_call_operand.vmem [shape: f32[9,128], index: 4, kind: input, shape index: {}]   ;;  %s3025_s5 = inlined_call_operand.hbm [shape: bf16[256,128], index: 5, kind: input, shape index: {}]   ;;  %s3026_s6 = inlined_call_operand.hbm [shape: bf16[2,128,128], index: 6, kind: input, shape index: {}]   ;;  %s3027_s7 = inlined_call_operand.vmem [shape: f32[2,128], index: 7, kind: output, shape index: {}]  }
   0x1   :  { %13 = vsyncpa [#allocation5], 0  ;;  %s2219_s24 = smov [#allocation4]   ;;  %s2149_s28 = scalar_lea.hbm %s3025_s5, 2048 }
   0x2   :  { %s39_s25 = sshll.u32 %s2219_s24, 4  ;;  %p2150_p0 = scmp.ne.s32.totalorder %s3025_s5, %s2149_s28  ;;  %s40_s25 = int_to_ptr.vmem [resolvable:$true] %s39_s25 }
   0x3   :  { %p2153_p1 = scmp.lt.u32.totalorder %s2149_s28, %s3025_s5 }
   0x5   :  { %p2155_p2 = pnand %p2153_p1, %p2150_p0 }
   0x7   :  { %2158 = shalt.err (!%p2155_p2)
}
   0x8   :  { %s2159_s10 = scalar_lea.vmem %s40_s25, 2048  ;;  %p2164_p4 = scmp.lt.s32.totalorder %s40_s25, %s40_s25 }
   0x9   :  { %p2160_p3 = scmp.ne.s32.totalorder %s40_s25, %s2159_s10  ;;  %p2165_p5 = scmp.lt.s32.totalorder %s2159_s10, %s2159_s10 }
   0xb   :  { %p2166_p6 = por %p2165_p5, %p2164_p4 }
   0xd   :  { %p2167_p7 = pnand %p2166_p6, %p2160_p3 }
   0xf   :  { %2170 = shalt.err (!%p2167_p7)
}
  0x10   :  { %s2220_s11 = smov 64   ;;  %s2221_s12 = smov 4  }
  0x11   :  { %45 = dma.hbm_to_vmem [thread:$0]  %s3025_s5, 2048, %s40_s25, [#allocation5], %s2220_s11, %s2220_s11, %s2221_s12  }
  0x12   :  { %s2222_s15 = smov [#allocation2]   ;;  %s2171_s19 = scalar_lea.hbm %s3023_s3, 6144 }
  0x13   :  { %s25_s16 = sshll.u32 %s2222_s15, 4  ;;  %p2172_p8 = scmp.ne.s32.totalorder %s3023_s3, %s2171_s19  ;;  %s26_s16 = int_to_ptr.vmem [resolvable:$true] %s25_s16 }
  0x14   :  { %p2175_p9 = scmp.lt.u32.totalorder %s2171_s19, %s3023_s3 }
  0x16   :  { %p2177_p10 = pnand %p2175_p9, %p2172_p8 }
  0x18   :  { %2180 = shalt.err (!%p2177_p10)
}
  0x19   :  { %s2181_s24 = scalar_lea.vmem %s26_s16, 6144  ;;  %p2186_p12 = scmp.lt.s32.totalorder %s26_s16, %s26_s16 }
  0x1a   :  { %p2182_p11 = scmp.ne.s32.totalorder %s26_s16, %s2181_s24  ;;  %p2187_p13 = scmp.lt.s32.totalorder %s2181_s24, %s2181_s24 }
  0x1c   :  { %p2188_p0 = por %p2187_p13, %p2186_p12 }
  0x1e   :  { %p2189_p1 = pnand %p2188_p0, %p2182_p11 }
  0x20   :  { %2192 = shalt.err (!%p2189_p1)
}
  0x21   :  { %s2223_s5 = smov 128   ;;  %s2224_s25 = smov 8  }
  0x22   :  { %31 = dma.hbm_to_vmem [thread:$0]  %s3023_s3, 6144, %s26_s16, [#allocation3], %s2223_s5, %s2223_s5, %s2224_s25  }
  0x23   :  { %s2225_s28 = smov [#allocation6]   ;;  %s2193_s9 = scalar_lea.hbm %s3026_s6, 2048 }
  0x24   :  { %s51_s29 = sshll.u32 %s2225_s28, 4  ;;  %p2194_p2 = scmp.ne.s32.totalorder %s3026_s6, %s2193_s9  ;;  %s52_s29 = int_to_ptr.vmem [resolvable:$true] %s51_s29 }
  0x25   :  { %p2197_p3 = scmp.lt.u32.totalorder %s2193_s9, %s3026_s6 }
  0x27   :  { %p2199_p4 = pnand %p2197_p3, %p2194_p2 }
  0x29   :  { %2202 = shalt.err (!%p2199_p4)
}
  0x2a   :  { %s2203_s17 = scalar_lea.vmem %s52_s29, 2048  ;;  %p2208_p6 = scmp.lt.s32.totalorder %s52_s29, %s52_s29 }
  0x2b   :  { %p2204_p5 = scmp.ne.s32.totalorder %s52_s29, %s2203_s17  ;;  %p2209_p7 = scmp.lt.s32.totalorder %s2203_s17, %s2203_s17 }
  0x2d   :  { %p2210_p8 = por %p2209_p7, %p2208_p6 }
  0x2f   :  { %p2211_p9 = pnand %p2210_p8, %p2204_p5 }
  0x31   :  { %2214 = shalt.err (!%p2211_p9)
}
  0x32   :  { %57 = dma.hbm_to_vmem [thread:$0]  %s3026_s6, 2048, %s52_s29, [#allocation5], %s2220_s11, %s2220_s11, %s2221_s12  }
  0x33   :  { %2215 = dma.done.wait [#allocation3], 6144  }
  0x34   :  { %2216 = vsyncadd [#allocation3], 4294961152 }
  0x35   :  { %2217 = dma.done.wait [#allocation5], 4096  }
  0x36   :  { %2218 = vsyncadd [#allocation5], 4294963200  ;;  %v2226_v0 = vmov 0   ;;  %v2019_v1 = vld [vmem:[#allocation2 + $0x4] ss:$8 sps:$4 sm:$0xff]   ;;  %v2227_v18 = vmov 0.0   ;;  %v68_v27 = vlaneseq }
  0x37   :  { %243 = vmatprep.mubr.bf16.mxu0 %v2226_v0  ;;  %1987 = vset.pattern.permute.xlu1 %v2226_v0  ;;  %v2021_v2 = vld [vmem:[#allocation2] ss:$8 sps:$4 sm:$0xff]   ;;  %v2022_v3 = vld [vmem:[#allocation2 + $0x14] ss:$8 sps:$4 sm:$0xff]   ;;  %v2024_v4 = vld [vmem:[#allocation2 + $0x10] ss:$8 sps:$4 sm:$0xff]  }
  0x38   :  { %1988 = vset.pattern.permute.xlu0 %v2226_v0  ;;  %211 = vmatprep.subr.bf16.mxu0 %v2019_v1  ;;  %v2025_v5 = vld [vmem:[#allocation2 + $0x24] ss:$8 sps:$4 sm:$0xff]   ;;  %v2027_v6 = vld [vmem:[#allocation2 + $0x20] ss:$8 sps:$4 sm:$0xff]   ;;  %v2028_v7 = vld [vmem:[#allocation2 + $0x34] ss:$8 sps:$4 sm:$0xff]  }
  0x39   :  { %212 = vmatpush1.bf16.msra.mxu0 %v2021_v2  ;;  %v2030_v8 = vld [vmem:[#allocation2 + $0x30] ss:$8 sps:$4 sm:$0xff]   ;;  %v2031_v9 = vld [vmem:[#allocation2 + $0x44] ss:$8 sps:$4 sm:$0xff]   ;;  %v2033_v10 = vld [vmem:[#allocation2 + $0x40] ss:$8 sps:$4 sm:$0xff]   ;;  %1907 = vmatprep.subr.bf16.mxu1 %v2227_v18 }
  0x3a   :  { %213 = vmatprep.subr.bf16.mxu0 %v2022_v3  ;;  %v2034_v11 = vld [vmem:[#allocation2 + $0x54] ss:$8 sps:$4 sm:$0xff]   ;;  %v2036_v12 = vld [vmem:[#allocation2 + $0x50] ss:$8 sps:$4 sm:$0xff]   ;;  %v2037_v13 = vld [vmem:[#allocation2 + $0x64] ss:$8 sps:$4 sm:$0xff]  }
  0x3b   :  { %v2039_v14 = vld [vmem:[#allocation2 + $0x60] ss:$8 sps:$4 sm:$0xff]   ;;  %v2040_v15 = vld [vmem:[#allocation2 + $0x74] ss:$8 sps:$4 sm:$0xff]   ;;  %v2042_v16 = vld [vmem:[#allocation2 + $0x70] ss:$8 sps:$4 sm:$0xff]  }
  0x3c   :  { %v2043_v17 = vld [vmem:[%s3020_s0] sm:$0xff]   ;;  %vm3030_vm0 = vmmov 0   ;;  %vm3041_vm1 = vcmask 130048   ;;  %v2340_v26 = vld [vmem:[%s3022_s2 + $0x8] sm:$0xff]  ;;  %v2348_v36 = vshrl.u32 %v68_v27, 7  ;;  %v2350_v37 = vand.u32 127, %v68_v27 }
  0x3d   :  { %214 = vmatpush1.bf16.msra.mxu0 %v2024_v4  ;;  %1909 = vmatprep.mubr.msk.bf16.mxu1 %vm3030_vm0, %v2227_v18  ;;  %v2326_v24 = vld [vmem:[%s3021_s1] sm:$0xff]   ;;  %v3055_v48 = vmov 0  ;;  %v2050_v3 = vld [vmem:[#allocation2 + $0x94] ss:$8 sps:$4 sm:$0xff]   ;;  %v2048_v4 = vld [vmem:[#allocation2 + $0x90] ss:$8 sps:$4 sm:$0xff]  }
  0x3e   :  { %215 = vmatprep.subr.bf16.mxu0 %v2025_v5  ;;  %v2334_v25 = vld [vmem:[%s3022_s2] sm:$0xff]  ;;  %vm2363_vm2 = vcmp.eq.s32.totalorder %v2348_v36, %v2350_v37  ;;  %v2368_v44 = vadd.s32 8, %v2348_v36  ;;  %vm3049_vm6 = vcmp.lt.s32.totalorder %v2350_v37, %v2348_v36 }
  0x3f   :  { %81 = vperm.xlu1 %1987, %v2334_v25   ;;  %v1768_v29 = vld [vmem:[%s3024_s4] ss:$0 sm:$0xff]  ;;  %v1769_v38 = vld [vmem:[%s3024_s4 + $0x3] ss:$0 sm:$0xff]  ;;  %v2047_v2 = vld [vmem:[#allocation2 + $0x84] ss:$8 sps:$4 sm:$0xff]  }
  0x40   :  { %vm2379_vm3 = vcmp.eq.s32.totalorder %v2368_v44, %v2350_v37  ;;  %v2045_v1 = vld [vmem:[#allocation2 + $0x80] ss:$8 sps:$4 sm:$0xff]   ;;  %v2053_v5 = vld [vmem:[#allocation2 + $0xa4] ss:$8 sps:$4 sm:$0xff]   ;;  %vm3039_vm11 = vcmp.lt.s32.totalorder %v2350_v37, %v2368_v44 }
  0x41   :  { %216 = vmatpush1.bf16.msra.mxu0 %v2027_v6  ;;  %v3056_v48 = vsel %vm2379_vm3, 4294967295, %v3055_v48  ;;  %v2051_v6 = vld [vmem:[#allocation2 + $0xa0] ss:$8 sps:$4 sm:$0xff]  }
  0x42   :  { %217 = vmatprep.subr.bf16.mxu0 %v2028_v7  ;;  %v2056_v7 = vld [vmem:[#allocation2 + $0xb4] ss:$8 sps:$4 sm:$0xff]  }
  0x43   :  { %86 = vperm.xlu1 %1987, %v2340_v26  }
  0x45   :  { %218 = vmatpush1.bf16.msra.mxu0 %v2030_v8  ;;  %v2054_v8 = vld [vmem:[#allocation2 + $0xb0] ss:$8 sps:$4 sm:$0xff]  }
  0x46   :  { %219 = vmatprep.subr.bf16.mxu0 %v2031_v9  ;;  %v2059_v9 = vld [vmem:[#allocation2 + $0xc4] ss:$8 sps:$4 sm:$0xff]  }
  0x49   :  { %220 = vmatpush1.bf16.msra.mxu0 %v2033_v10  ;;  %v2057_v10 = vld [vmem:[#allocation2 + $0xc0] ss:$8 sps:$4 sm:$0xff]  }
  0x4a   :  { %221 = vmatprep.subr.bf16.mxu0 %v2034_v11 }
  0x4d   :  { %222 = vmatpush1.bf16.msra.mxu0 %v2036_v12 }
  0x4e   :  { %223 = vmatprep.subr.bf16.mxu0 %v2037_v13 }
  0x51   :  { %224 = vmatpush1.bf16.msra.mxu0 %v2039_v14 }
  0x52   :  { %225 = vmatprep.subr.bf16.mxu0 %v2040_v15 }
  0x55   :  { %226 = vmatpush1.bf16.msra.mxu0 %v2042_v16 }
  0x56   :  { %1919 = vmatprep.subr.bf16.mxu0 %v2227_v18 }
  0x58   :  { %244 = vmatmul.mubr.bf16.vlgmr.msra.gmra.mrb[0].mxu0 %v2043_v17 }
  0x59   :  { %1921 = vmatprep.mubr.msk.bf16.mxu0 %vm3030_vm0, %v2227_v18 }
  0xbe   :  { %v2370_v45 = vpop.permute.xlu1 %81 }
  0xbf   :  { %v89_v46 = vsel %vm2363_vm2, %v2370_v45, 0.0 }
  0xc0   :  { %v92_v49 = vsel %vm3041_vm1, %v89_v46, 0.0  ;;  %v2063_v46 = vld [vmem:[#allocation2 + $0xe0] ss:$8 sps:$4 sm:$0xff]  }
  0xc2   :  { %v2384_v50 = vpop.permute.xlu1 %86 }
  0xc3   :  { %v90_v51 = vsel %vm2379_vm3, %v2384_v50, 0.0 }
  0xc4   :  { %v93_v52 = vsel %vm3041_vm1, %v90_v51, 0.0 }
  0xc5   :  { %v94_v53 = vadd.f32 %v93_v52, %v92_v49  ;;  %v2066_v49 = vld [vmem:[#allocation2 + $0xf0] ss:$8 sps:$4 sm:$0xff]  }
  0xc7   :  { %v95_v54 = vrot.slane %v94_v53, 4 }
  0xc9   :  { %v96_v55 = vadd.f32 %v95_v54, %v94_v53 }
  0xcb   :  { %v97_v56 = vrot.slane %v96_v55, 2 }
  0xcd   :  { %v98_v57 = vadd.f32 %v97_v56, %v96_v55 }
  0xcf   :  { %v99_v58 = vrot.slane %v98_v57, 1 }
  0xd1   :  { %v2390_v59 = vadd.f32 %v99_v58, %v98_v57 }
  0xd3   :  { %vm3033_vm4 = vcmp.eq.f32.partialorder %v2384_v50, %v2390_v59  ;;  %vm3034_vm5 = vcmp.eq.f32.partialorder %v2370_v45, %v2390_v59 }
  0xd4   :  { %v347_v60 = vsel %vm3033_vm4, 1.0, %v2227_v18  ;;  %v346_v61 = vsel %vm3034_vm5, 1.0, %v2227_v18 }
  0xd5   :  { %v351_v62 = vsel %vm3041_vm1, %v347_v60, 0.0  ;;  %v348_v63 = vsel %vm3041_vm1, %v346_v61, 0.0  ;;  %v3057_v60 = vmov 0 }
  0xd6   :  { %352 = vadd.xlane.f32.xlu1 %v351_v62 }
 0x12b   :  { %v245_v19 = vpop.f32.mrb[0].mxu0 }
 0x12c   :  { %v247_v20 = vpop.f32.mrb[1].mxu0 }
 0x12d   :  { %v249_v21 = vpop.f32.mrb[2].mxu0 }
 0x12e   :  { %v251_v22 = vpop.f32.mrb[3].mxu0 }
 0x12f   :  { %v254_v23 = vpack.c.bf16 %v251_v22, %v247_v20 }
 0x131   :  { %1908 = vmatpush3.bf16.msra.mxu1 %v254_v23 }
 0x132   :  { %628 = vmatprep.subr.bf16.mxu1 %v2047_v2 }
 0x134   :  { %1910 = vmatmul.mubr.msk.bf16.vlgmr.msra.gmra.mrb[0].mxu1 %vm3041_vm1, %v2326_v24 }
 0x135   :  { %660 = vmatprep.mubr.bf16.mxu1 %v2226_v0  ;;  %629 = vmatpush1.bf16.msra.mxu1 %v2045_v1 }
 0x136   :  { %630 = vmatprep.subr.bf16.mxu1 %v2050_v3 }
 0x139   :  { %631 = vmatpush1.bf16.msra.mxu1 %v2048_v4 }
 0x13a   :  { %632 = vmatprep.subr.bf16.mxu1 %v2053_v5 }
 0x13d   :  { %633 = vmatpush1.bf16.msra.mxu1 %v2051_v6 }
 0x13e   :  { %634 = vmatprep.subr.bf16.mxu1 %v2056_v7  ;;  %v3061_v7 = vmov 0 }
 0x141   :  { %635 = vmatpush1.bf16.msra.mxu1 %v2054_v8 }
 0x142   :  { %636 = vmatprep.subr.bf16.mxu1 %v2059_v9 }
 0x145   :  { %637 = vmatpush1.bf16.msra.mxu1 %v2057_v10 }
 0x163   :  { %v353_v52 = vpop.xlane.xlu1 %352 }
 0x164   :  { %v355_v54 = vmul.f32 0.8, %v353_v52 }
 0x166   :  { %v357_v57 = vceil.f32 %v355_v54 }
 0x207   :  { %v297_v28 = vpop.f32.mrb[0].mxu1 }
 0x208   :  { %v304_v30 = vadd.f32 %v297_v28, %v245_v19  ;;  %v1911_v31 = vpop.f32.mrb[1].mxu1 }
 0x209   :  { %v300_v32 = vpop.f32.mrb[2].mxu1 }
 0x20a   :  { %v305_v33 = vadd.f32 %v300_v32, %v249_v21  ;;  %v1912_v34 = vpop.f32.mrb[3].mxu1  ;;  %v2346_v35 = vadd.f32 %v1768_v29, %v304_v30 }
 0x20b   :  { %v2062_v34 = vld [vmem:[#allocation2 + $0xd4] ss:$8 sps:$4 sm:$0xff]  }
 0x20c   :  { %v2355_v39 = vadd.f32 %v1768_v29, %v305_v33  ;;  %v313_v40 = vmax.f32 %v2346_v35, 0.0  ;;  %638 = vmatprep.subr.bf16.mxu1 %v2062_v34 }
 0x20e   :  { %v314_v41 = vmax.f32 %v2355_v39, 0.0  ;;  %v320_v42 = vmul.f32 %v1769_v38, %v313_v40 }
 0x210   :  { %322 = vadd.xlane.f32.xlu0 %v320_v42  ;;  %v321_v47 = vmul.f32 %v1769_v38, %v314_v41  ;;  %v2060_v38 = vld [vmem:[#allocation2 + $0xd0] ss:$8 sps:$4 sm:$0xff]   ;;  %v2065_v42 = vld [vmem:[#allocation2 + $0xe4] ss:$8 sps:$4 sm:$0xff]  }
 0x211   :  { %639 = vmatpush1.bf16.msra.mxu1 %v2060_v38 }
 0x212   :  { %640 = vmatprep.subr.bf16.mxu1 %v2065_v42  ;;  %v1793_v42 = vld [vmem:[%s3024_s4 + $0x1] ss:$0 sm:$0xff] }
 0x214   :  { %324 = vadd.xlane.f32.xlu0 %v321_v47  ;;  %v2068_v47 = vld [vmem:[#allocation2 + $0xf4] ss:$8 sps:$4 sm:$0xff]  }
 0x215   :  { %641 = vmatpush1.bf16.msra.mxu1 %v2063_v46 }
 0x216   :  { %642 = vmatprep.subr.bf16.mxu1 %v2068_v47 }
 0x218   :  { %349 = vadd.xlane.f32.xlu0 %v348_v63  ;;  %v3059_v63 = vmov 0 }
 0x219   :  { %643 = vmatpush1.bf16.msra.mxu1 %v2066_v49 }
 0x21a   :  { %1913 = vmatprep.subr.bf16.mxu1 %v2227_v18 }
 0x29d   :  { %v323_v11 = vpop.xlane.xlu0 %322 }
 0x29e   :  { %2125 = vtanh.f32 %v323_v11 }
 0x2a1   :  { %v325_v12 = vpop.xlane.xlu0 %324 }
 0x2a2   :  { %2127 = vtanh.f32 %v325_v12 }
 0x2a5   :  { %v350_v51 = vpop.xlane.xlu0 %349 }
 0x2a6   :  { %v354_v53 = vmul.f32 0.8, %v350_v51 }
 0x2a8   :  { %v2126_v13 = vpop.eup %2125  ;;  %v356_v55 = vceil.f32 %v354_v53 }
 0x2a9   :  { %v331_v14 = vsel %vm2363_vm2, %v2126_v13, 0.0 }
 0x2aa   :  { %v333_v17 = vsel %vm3041_vm1, %v331_v14, 0.0 }
 0x2ac   :  { %v2408_v15 = vpop.eup %2127 }
 0x2ad   :  { %v332_v16 = vsel %vm2379_vm3, %v2408_v15, 0.0 }
 0x2ae   :  { %v334_v19 = vsel %vm3041_vm1, %v332_v16, 0.0 }
 0x2af   :  { %v335_v20 = vadd.f32 %v334_v19, %v333_v17 }
 0x2b1   :  { %v336_v21 = vrot.slane %v335_v20, 4 }
 0x2b3   :  { %v337_v22 = vadd.f32 %v336_v21, %v335_v20 }
 0x2b5   :  { %v338_v23 = vrot.slane %v337_v22, 2 }
 0x2b7   :  { %v339_v27 = vadd.f32 %v338_v23, %v337_v22 }
 0x2b9   :  { %v340_v28 = vrot.slane %v339_v27, 1 }
 0x2bb   :  { %v341_v29 = vadd.f32 %v340_v28, %v339_v27 }
 0x2bd   :  { %vm358_vm7 = vcmp.gt.f32.partialorder %v341_v29, %v2126_v13  ;;  %vm360_vm8 = vcmp.eq.f32.partialorder %v341_v29, %v2126_v13  ;;  %vm361_vm10 = vcmp.eq.f32.partialorder %v341_v29, %v2408_v15  ;;  %vm359_vm13 = vcmp.gt.f32.partialorder %v341_v29, %v2408_v15 }
 0x2be   :  { %vm364_vm9 = vmand %vm360_vm8, %vm3049_vm6 }
 0x2bf   :  { %vm366_vm12 = vmor %vm358_vm7, %vm364_vm9  ;;  %vm3028_vm9 = vcmp.eq.f32.partialorder %v2334_v25, 0.0 }
 0x2c0   :  { %vm368_vm14 = vmand %vm3034_vm5, %vm366_vm12 }
 0x2c1   :  { %v370_v30 = vsel %vm368_vm14, 1.0, %v2227_v18  ;;  %vm365_vm15 = vmand %vm361_vm10, %vm3039_vm11  ;;  %vm3029_vm10 = vcmp.eq.f32.partialorder %v2334_v25, 1.0 }
 0x2c2   :  { %v372_v31 = vsel %vm3041_vm1, %v370_v30, 0.0  ;;  %vm367_vm8 = vmor %vm359_vm13, %vm365_vm15  ;;  %vm3036_vm13 = vcmp.eq.f32.partialorder %v2340_v26, 0.0 }
 0x2c3   :  { %373 = vadd.xlane.f32.xlu0 %v372_v31  ;;  %vm369_vm7 = vmand %vm3033_vm4, %vm367_vm8  ;;  %vm3035_vm8 = vcmask 7168  }
 0x2c4   :  { %v371_v32 = vsel %vm369_vm7, 1.0, %v2227_v18  ;;  %vm3032_vm7 = vcmp.eq.f32.partialorder %v2340_v26, 1.0 }
 0x2c5   :  { %v375_v33 = vsel %vm3041_vm1, %v371_v32, 0.0 }
 0x2c7   :  { %376 = vadd.xlane.f32.xlu0 %v375_v33 }
 0x350   :  { %v374_v56 = vpop.xlane.xlu0 %373 }
 0x351   :  { %vm378_vm12 = vcmp.lt.f32.partialorder %v374_v56, %v356_v55  ;;  %v1794_v55 = vld [vmem:[%s3024_s4 + $0x4] ss:$0 sm:$0xff] }
 0x352   :  { %v2442_v58 = vsel %vm378_vm12, 1.0, %v2227_v18  ;;  %vm2446_vm14 = vmand %vm3028_vm9, %vm378_vm12 }
 0x353   :  { %v3058_v60 = vsel %vm2446_vm14, 4294967295, %v3057_v60  ;;  %v386_v61 = vsel %vm2363_vm2, %v2442_v58, 0.0  ;;  %v397_v62 = vmul.f32 %v2126_v13, %v2442_v58  ;;  %vm2456_vm15 = vmand %vm3029_vm10, %vm378_vm12  ;;  %v2463_v1 = vsel %vm2446_vm14, 1.0, %v2227_v18 }
 0x354   :  { %v3060_v63 = vsel %vm2456_vm15, 4294967295, %v3059_v63  ;;  %v377_v2 = vpop.xlane.xlu0 %376  ;;  %v2469_v3 = vsel %vm2456_vm15, 1.0, %v2227_v18  ;;  %v388_v4 = vsel %vm3041_vm1, %v386_v61, 0.0  ;;  %v409_v8 = vsel %vm3035_vm8, %v2463_v1, 0.0 }
 0x355   :  { %vm379_vm9 = vcmp.lt.f32.partialorder %v377_v2, %v357_v57  ;;  %v2474_v5 = vmul.f32 %v397_v62, %v313_v40  ;;  %v3063_v40 = vmov 0  ;;  %v473_v10 = vsel %vm3035_vm8, %v2469_v3, 0.0  ;;  %v2086_v2 = vld [vmem:[#allocation2 + $0x154] ss:$8 sps:$4 sm:$0xff]  }
 0x356   :  { %v2477_v6 = vsel %vm379_vm9, 1.0, %v2227_v18  ;;  %vm2481_vm12 = vmand %vm3036_vm13, %vm379_vm9 }
 0x357   :  { %v3062_v7 = vsel %vm2481_vm12, 4294967295, %v3061_v7  ;;  %v387_v9 = vsel %vm2379_vm3, %v2477_v6, 0.0  ;;  %v398_v35 = vmul.f32 %v2408_v15, %v2477_v6  ;;  %vm2494_vm10 = vmand %vm3032_vm7, %vm379_vm9  ;;  %v2503_v11 = vsel %vm2481_vm12, 1.0, %v2227_v18 }
 0x358   :  { %v3064_v40 = vsel %vm2494_vm10, 4294967295, %v3063_v40  ;;  %v389_v12 = vsel %vm3041_vm1, %v387_v9, 0.0  ;;  %v2509_v13 = vsel %vm2494_vm10, 1.0, %v2227_v18  ;;  %v410_v14 = vsel %vm3035_vm8, %v2503_v11, 0.0 }
 0x359   :  { %v1999_v15 = vpack.i.bf16 %v2503_v11, %v2463_v1  ;;  %v390_v16 = vadd.f32 %v389_v12, %v388_v4  ;;  %v2517_v17 = vmul.f32 %v398_v35, %v314_v41  ;;  %v474_v19 = vsel %vm3035_vm8, %v2509_v13, 0.0  ;;  %v2095_v1 = vld [vmem:[#allocation4 + $0x48] sm:$0xff]  }
 0x35a   :  { %v2521_v20 = vadd.f32 %v410_v14, %v409_v8  ;;  %v2523_v21 = vadd.f32 %v474_v19, %v473_v10  ;;  %v1989_v22 = vpack.i.bf16 %v2509_v13, %v2469_v3  ;;  %v2069_v14 = vld [vmem:[#allocation2 + $0x100] ss:$8 sps:$4 sm:$0xff]   ;;  %v2074_v19 = vld [vmem:[#allocation2 + $0x114] ss:$8 sps:$4 sm:$0xff]   ;;  %vm3070_vm10 = vcmask 130048  }
 0x35b   :  { %v401_v23 = vpack.c.bf16 %v2517_v17, %v2474_v5  ;;  %v391_v30 = vrot.slane %v390_v16, 4  ;;  %v2096_v11 = vld [vmem:[#allocation4 + $0x8] sm:$0xff]  }
 0x35d   :  { %661 = vmatmul.mubr.bf16.vlgmr.msra.gmra.mrb[4].mxu1 %v401_v23  ;;  %v392_v31 = vadd.f32 %v391_v30, %v390_v16  ;;  %v2071_v16 = vld [vmem:[#allocation2 + $0x104] ss:$8 sps:$4 sm:$0xff]   ;;  %v2072_v23 = vld [vmem:[#allocation2 + $0x110] ss:$8 sps:$4 sm:$0xff]   ;;  %v2081_v30 = vld [vmem:[#allocation2 + $0x140] ss:$8 sps:$4 sm:$0xff]  }
 0x35e   :  { %1915 = vmatprep.mubr.msk.bf16.mxu1 %vm3030_vm0, %v2227_v18 }
 0x35f   :  { %v393_v32 = vrot.slane %v392_v31, 2 }
 0x361   :  { %v394_v33 = vadd.f32 %v393_v32, %v392_v31 }
 0x363   :  { %v395_v34 = vrot.slane %v394_v33, 1 }
 0x365   :  { %v396_v54 = vadd.f32 %v395_v34, %v394_v33 }
 0x367   :  { %vm739_vm9 = vcmp.gt.f32.partialorder %v396_v54, 0.5 }
 0x368   :  { %vm2551_vm0 = vmand %vm3034_vm5, %vm739_vm9 }
 0x369   :  { %v757_v8 = vsel %vm2551_vm0, 1.0, %v2227_v18  ;;  %vm2563_vm7 = vmand %vm3033_vm4, %vm739_vm9  ;;  %vm3038_vm9 = vcmp.gt.f32.partialorder %v2442_v58, 0.5  ;;  %vm3037_vm4 = vcmp.gt.f32.partialorder %v2477_v6, 0.5 }
 0x36a   :  { %v759_v35 = vsel %vm3041_vm1, %v757_v8, 0.0  ;;  %v758_v10 = vsel %vm2563_vm7, 1.0, %v2227_v18 }
 0x36b   :  { %v762_v12 = vsel %vm3041_vm1, %v758_v10, 0.0 }
 0x430   :  { %v662_v39 = vpop.f32.mrb[4].mxu1 }
 0x431   :  { %v664_v41 = vpop.f32.mrb[5].mxu1 }
 0x432   :  { %v666_v27 = vpop.f32.mrb[6].mxu1 }
 0x433   :  { %v668_v28 = vpop.f32.mrb[7].mxu1 }
 0x434   :  { %v671_v29 = vpack.c.bf16 %v668_v28, %v664_v41  ;;  %v2075_v41 = vld [vmem:[#allocation2 + $0x120] ss:$8 sps:$4 sm:$0xff]   ;;  %v2078_v28 = vld [vmem:[#allocation2 + $0x130] ss:$8 sps:$4 sm:$0xff]  }
 0x436   :  { %1914 = vmatpush3.bf16.msra.mxu1 %v671_v29  ;;  %v2083_v29 = vld [vmem:[#allocation2 + $0x144] ss:$8 sps:$4 sm:$0xff]  }
 0x437   :  { %1036 = vmatprep.subr.bf16.mxu1 %v2071_v16 }
 0x439   :  { %1916 = vmatmul.mubr.msk.bf16.vlgmr.msra.gmra.mrb[8].mxu1 %vm3041_vm1, %v2326_v24 }
 0x43a   :  { %1068 = vmatprep.mubr.bf16.mxu1 %v2226_v0  ;;  %1037 = vmatpush1.bf16.msra.mxu1 %v2069_v14 }
 0x43b   :  { %1038 = vmatprep.subr.bf16.mxu1 %v2074_v19  ;;  %v2084_v19 = vld [vmem:[#allocation2 + $0x150] ss:$8 sps:$4 sm:$0xff]  }
 0x43e   :  { %1039 = vmatpush1.bf16.msra.mxu1 %v2072_v23  ;;  %v2089_v23 = vld [vmem:[#allocation2 + $0x164] ss:$8 sps:$4 sm:$0xff]  }
 0x50c   :  { %v706_v38 = vpop.f32.mrb[8].mxu1 }
 0x50d   :  { %v713_v46 = vadd.f32 %v706_v38, %v662_v39  ;;  %v1917_v47 = vpop.f32.mrb[9].mxu1  ;;  %v2077_v39 = vld [vmem:[#allocation2 + $0x124] ss:$8 sps:$4 sm:$0xff]  }
 0x50e   :  { %v709_v49 = vpop.f32.mrb[10].mxu1  ;;  %1040 = vmatprep.subr.bf16.mxu1 %v2077_v39  ;;  %v2087_v39 = vld [vmem:[#allocation2 + $0x160] ss:$8 sps:$4 sm:$0xff]  }
 0x50f   :  { %v2537_v51 = vadd.f32 %v1793_v42, %v713_v46  ;;  %v714_v52 = vadd.f32 %v709_v49, %v666_v27  ;;  %v1918_v53 = vpop.f32.mrb[11].mxu1  ;;  %v2080_v27 = vld [vmem:[#allocation2 + $0x134] ss:$8 sps:$4 sm:$0xff]   ;;  %1041 = vmatpush1.bf16.msra.mxu1 %v2075_v41  ;;  %v2090_v41 = vld [vmem:[#allocation2 + $0x170] ss:$8 sps:$4 sm:$0xff]  }
 0x510   :  { %1042 = vmatprep.subr.bf16.mxu1 %v2080_v27  ;;  %v2092_v27 = vld [vmem:[#allocation2 + $0x174] ss:$8 sps:$4 sm:$0xff]  }
 0x511   :  { %v722_v56 = vmax.f32 %v2537_v51, 0.0  ;;  %v2543_v57 = vadd.f32 %v1793_v42, %v714_v52 }
 0x513   :  { %v723_v61 = vmax.f32 %v2543_v57, 0.0  ;;  %v729_v62 = vmul.f32 %v1794_v55, %v722_v56  ;;  %1043 = vmatpush1.bf16.msra.mxu1 %v2078_v28 }
 0x514   :  { %1044 = vmatprep.subr.bf16.mxu1 %v2083_v29 }
 0x515   :  { %731 = vadd.xlane.f32.xlu0 %v729_v62  ;;  %v730_v4 = vmul.f32 %v1794_v55, %v723_v61 }
 0x517   :  { %1045 = vmatpush1.bf16.msra.mxu1 %v2081_v30 }
 0x518   :  { %1046 = vmatprep.subr.bf16.mxu1 %v2086_v2 }
 0x519   :  { %733 = vadd.xlane.f32.xlu0 %v730_v4 }
 0x51b   :  { %1047 = vmatpush1.bf16.msra.mxu1 %v2084_v19 }
 0x51c   :  { %1048 = vmatprep.subr.bf16.mxu1 %v2089_v23 }
 0x51d   :  { %760 = vadd.xlane.f32.xlu0 %v759_v35 }
 0x51f   :  { %1049 = vmatpush1.bf16.msra.mxu1 %v2087_v39 }
 0x520   :  { %1050 = vmatprep.subr.bf16.mxu1 %v2092_v27 }
 0x521   :  { %763 = vadd.xlane.f32.xlu0 %v762_v12 }
 0x523   :  { %1051 = vmatpush1.bf16.msra.mxu1 %v2090_v41 }
 0x524   :  { %1925 = vmatprep.subr.bf16.mxu1 %v2227_v18 }
 0x5a2   :  { %v732_v31 = vpop.xlane.xlu0 %731 }
 0x5a3   :  { %2129 = vtanh.f32 %v732_v31 }
 0x5a6   :  { %v734_v32 = vpop.xlane.xlu0 %733 }
 0x5a7   :  { %2131 = vtanh.f32 %v734_v32 }
 0x5aa   :  { %v761_v9 = vpop.xlane.xlu0 %760 }
 0x5ab   :  { %v765_v28 = vmul.f32 0.8, %v761_v9 }
 0x5ad   :  { %v2130_v33 = vpop.eup %2129  ;;  %v767_v30 = vceil.f32 %v765_v28 }
 0x5ae   :  { %v740_v34 = vsel %vm3038_vm9, %v2130_v33, -1e+30  ;;  %v764_v29 = vpop.xlane.xlu0 %763 }
 0x5af   :  { %v742_v42 = vsel %vm2363_vm2, %v740_v34, 0.0  ;;  %v766_v31 = vmul.f32 0.8, %v764_v29 }
 0x5b0   :  { %v744_v49 = vsel %vm3041_vm1, %v742_v42, 0.0 }
 0x5b1   :  { %v2575_v38 = vpop.eup %2131 }
 0x5b2   :  { %v741_v46 = vsel %vm3037_vm4, %v2575_v38, -1e+30 }
 0x5b3   :  { %v743_v47 = vsel %vm2379_vm3, %v741_v46, 0.0 }
 0x5b4   :  { %v745_v52 = vsel %vm3041_vm1, %v743_v47, 0.0  ;;  %vm3069_vm1 = vcmp.lt.s32.totalorder %v2350_v37, %v2368_v44 }
 0x5b5   :  { %v746_v53 = vadd.f32 %v745_v52, %v744_v49 }
 0x5b7   :  { %v747_v54 = vrot.slane %v746_v53, 4 }
 0x5b9   :  { %v748_v55 = vadd.f32 %v747_v54, %v746_v53 }
 0x5bb   :  { %v749_v62 = vrot.slane %v748_v55, 2 }
 0x5bd   :  { %v750_v4 = vadd.f32 %v749_v62, %v748_v55 }
 0x5bf   :  { %v751_v8 = vrot.slane %v750_v4, 1 }
 0x5c1   :  { %v752_v35 = vadd.f32 %v751_v8, %v750_v4  ;;  %v3082_v4 = vmov 0 }
 0x5c3   :  { %vm769_vm5 = vcmp.gt.f32.partialorder %v752_v35, %v740_v34  ;;  %vm771_vm8 = vcmp.eq.f32.partialorder %v752_v35, %v740_v34  ;;  %vm772_vm4 = vcmp.eq.f32.partialorder %v752_v35, %v741_v46  ;;  %vm770_vm11 = vcmp.gt.f32.partialorder %v752_v35, %v741_v46 }
 0x5c4   :  { %vm773_vm13 = vmand %vm771_vm8, %vm3049_vm6  ;;  %v768_v34 = vceil.f32 %v766_v31  ;;  %v3074_v46 = vmov 0 }
 0x5c5   :  { %vm775_vm9 = vmor %vm769_vm5, %vm773_vm13 }
 0x5c6   :  { %vm777_vm12 = vmand %vm2551_vm0, %vm775_vm9 }
 0x5c7   :  { %v779_v10 = vsel %vm777_vm12, 1.0, %v2227_v18  ;;  %vm774_vm14 = vmand %vm772_vm4, %vm3069_vm1  ;;  %vm3072_vm1 = vcmp.gt.f32.partialorder %v2442_v58, 0.5  ;;  %vm3073_vm4 = vcmp.eq.f32.partialorder %v2334_v25, 0.0  ;;  %vm3081_vm12 = vcmp.eq.f32.partialorder %v2340_v26, 0.0 }
 0x5c8   :  { %v781_v12 = vsel %vm3070_vm10, %v779_v10, 0.0  ;;  %vm776_vm15 = vmor %vm770_vm11, %vm774_vm14 }
 0x5c9   :  { %782 = vadd.xlane.f32.xlu0 %v781_v12  ;;  %vm778_vm3 = vmand %vm2563_vm7, %vm776_vm15  ;;  %vm3079_vm15 = vcmp.gt.f32.partialorder %v2477_v6, 0.5 }
 0x5ca   :  { %v780_v14 = vsel %vm778_vm3, 1.0, %v2227_v18  ;;  %vm3071_vm5 = vmmov %vm3070_vm10  ;;  %vm3076_vm10 = vcmp.eq.f32.partialorder %v2334_v25, 1.0 }
 0x5cb   :  { %v784_v16 = vsel %vm3071_vm5, %v780_v14, 0.0  ;;  %vm3080_vm7 = vmmov %vm3071_vm5  ;;  %vm3084_vm5 = vcmask 7168  }
 0x5cd   :  { %785 = vadd.xlane.f32.xlu0 %v784_v16 }
 0x656   :  { %v783_v32 = vpop.xlane.xlu0 %782 }
 0x657   :  { %vm787_vm0 = vcmp.lt.f32.partialorder %v783_v32, %v767_v30 }
 0x658   :  { %vm789_vm3 = vmand %vm3072_vm1, %vm787_vm0  ;;  %vm3085_vm0 = vnez %v3056_v48  ;;  %vm3086_vm1 = vcmp.eq.f32.partialorder %v2340_v26, 1.0 }
 0x659   :  { %v2605_v42 = vsel %vm789_vm3, 1.0, %v2227_v18  ;;  %vm2609_vm11 = vmand %vm3073_vm4, %vm789_vm3 }
 0x65a   :  { %v3075_v46 = vsel %vm2609_vm11, 4294967295, %v3074_v46  ;;  %v795_v47 = vsel %vm2363_vm2, %v2605_v42, 0.0  ;;  %v806_v49 = vmul.f32 %v2130_v33, %v2605_v42  ;;  %vm2619_vm13 = vmand %vm3076_vm10, %vm789_vm3  ;;  %v786_v52 = vpop.xlane.xlu0 %785  ;;  %v2626_v53 = vsel %vm2609_vm11, 1.0, %v2227_v18 }
 0x65b   :  { %vm788_vm14 = vcmp.lt.f32.partialorder %v786_v52, %v768_v34  ;;  %v2631_v54 = vsel %vm2619_vm13, 1.0, %v2227_v18  ;;  %v797_v33 = vsel %vm3080_vm7, %v795_v47, 0.0  ;;  %v817_v8 = vsel %vm3084_vm5, %v2626_v53, 0.0  ;;  %vm3089_vm4 = vmmov %vm3084_vm5 }
 0x65c   :  { %vm790_vm8 = vmand %vm3079_vm15, %vm788_vm14  ;;  %v2638_v55 = vmul.f32 %v806_v49, %v722_v56  ;;  %v3087_v56 = vmov 0  ;;  %v881_v35 = vsel %vm3089_vm4, %v2631_v54, 0.0  ;;  %vm3094_vm5 = vcmp.eq.f32.partialorder %v2370_v45, %v2390_v59 }
 0x65d   :  { %v2641_v62 = vsel %vm790_vm8, 1.0, %v2227_v18  ;;  %vm2645_vm9 = vmand %vm3081_vm12, %vm790_vm8 }
 0x65e   :  { %v3083_v4 = vsel %vm2645_vm9, 4294967295, %v3082_v4  ;;  %v796_v6 = vsel %vm3085_vm0, %v2641_v62, 0.0  ;;  %v807_v51 = vmul.f32 %v2575_v38, %v2641_v62  ;;  %vm2658_vm3 = vmand %vm3086_vm1, %vm790_vm8  ;;  %v2667_v10 = vsel %vm2645_vm9, 1.0, %v2227_v18 }
 0x65f   :  { %v3088_v56 = vsel %vm2658_vm3, 4294967295, %v3087_v56  ;;  %vm3090_vm10 = vmmov %vm3080_vm7  ;;  %v2673_v38 = vsel %vm2658_vm3, 1.0, %v2227_v18  ;;  %v2004_v16 = vpack.i.bf16 %v2667_v10, %v2626_v53  ;;  %vm3093_vm8 = vmmov 0  }
 0x660   :  { %v798_v12 = vsel %vm3090_vm10, %v796_v6, 0.0  ;;  %vm3091_vm14 = vmmov %vm3089_vm4  ;;  %v2681_v19 = vmul.f32 %v807_v51, %v723_v61  ;;  %v1994_v27 = vpack.i.bf16 %v2673_v38, %v2631_v54  ;;  %vm3106_vm9 = vcmask 130048  }
 0x661   :  { %v818_v14 = vsel %vm3091_vm14, %v2667_v10, 0.0  ;;  %v799_v2 = vadd.f32 %v798_v12, %v797_v33  ;;  %vm3092_vm15 = vmmov %vm3089_vm4  ;;  %vm3097_vm4 = vcmp.eq.f32.partialorder %v2384_v50, %v2390_v59  ;;  %v2093_v10 = vld [vmem:[#allocation4 + $0x40] sm:$0xff]  }
 0x662   :  { %v882_v23 = vsel %vm3092_vm15, %v2673_v38, 0.0  ;;  %v2685_v39 = vadd.f32 %v818_v14, %v817_v8  ;;  %v810_v9 = vpack.c.bf16 %v2681_v19, %v2638_v55  ;;  %v1818_v8 = vld [vmem:[%s3024_s4 + $0x2] ss:$0 sm:$0xff]  ;;  %vm3100_vm14 = vmmov %vm3080_vm7 }
 0x663   :  { %v2687_v41 = vadd.f32 %v882_v23, %v881_v35  ;;  %v800_v31 = vrot.slane %v799_v2, 4  ;;  %vm3101_vm15 = vmmov %vm3080_vm7 }
 0x664   :  { %1069 = vmatmul.mubr.bf16.vlgmr.msra.gmra.mrb[12].mxu1 %v810_v9 }
 0x665   :  { %1941 = vmatprep.mubr.msk.bf16.mxu1 %vm3093_vm8, %v2227_v18  ;;  %v801_v32 = vadd.f32 %v800_v31, %v799_v2 }
 0x667   :  { %v802_v34 = vrot.slane %v801_v32, 2 }
 0x669   :  { %v803_v47 = vadd.f32 %v802_v34, %v801_v32 }
 0x66b   :  { %v804_v49 = vrot.slane %v803_v47, 1 }
 0x66d   :  { %v805_v52 = vadd.f32 %v804_v49, %v803_v47 }
 0x66f   :  { %vm1147_vm12 = vcmp.gt.f32.partialorder %v805_v52, 0.5 }
 0x670   :  { %vm2711_vm1 = vmand %vm3094_vm5, %vm1147_vm12 }
 0x671   :  { %vm2721_vm10 = vmand %vm3097_vm4, %vm1147_vm12  ;;  %vm3048_vm12 = vcmp.gt.f32.partialorder %v2641_v62, 0.5 }
 0x672   :  { %v1166_v31 = vsel %vm2721_vm10, 1.0, %v2227_v18  ;;  %vm3102_vm5 = vmmov %vm3100_vm14 }
 0x673   :  { %v1170_v50 = vsel %vm3101_vm15, %v1166_v31, 0.0  ;;  %vm3103_vm4 = vmmov %vm3102_vm5  ;;  %vm3104_vm15 = vcmp.lt.s32.totalorder %v2350_v37, %v2368_v44 }
 0x737   :  { %v1070_v57 = vpop.f32.mrb[12].mxu1 }
 0x738   :  { %v1072_v61 = vpop.f32.mrb[13].mxu1 }
 0x739   :  { %v1074_v28 = vpop.f32.mrb[14].mxu1 }
 0x73a   :  { %v1076_v29 = vpop.f32.mrb[15].mxu1 }
 0x73b   :  { %v1079_v30 = vpack.c.bf16 %v1076_v29, %v1072_v61 }
 0x73d   :  { %1920 = vmatpush3.bf16.msra.mxu0 %v1079_v30  ;;  %v1165_v30 = vsel %vm2711_vm1, 1.0, %v2227_v18 }
 0x73e   :  { %v1167_v32 = vsel %vm3100_vm14, %v1165_v30, 0.0  ;;  %1867 = vmatprep.subr.bf16.mxu0 %v2093_v10 }
 0x740   :  { %1922 = vmatmul.mubr.msk.bf16.vlgmr.msra.gmra.mrb[4].mxu0 %vm3080_vm7, %v2326_v24  ;;  %v1819_v24 = vld [vmem:[%s3024_s4 + $0x5] ss:$0 sm:$0xff]  ;;  %vm3047_vm7 = vcmp.gt.f32.partialorder %v2605_v42, 0.5 }
 0x813   :  { %v1114_v33 = vpop.f32.mrb[4].mxu0 }
 0x814   :  { %v1121_v6 = vadd.f32 %v1114_v33, %v1070_v57  ;;  %v1923_v51 = vpop.f32.mrb[5].mxu0 }
 0x815   :  { %v1117_v35 = vpop.f32.mrb[6].mxu0 }
 0x816   :  { %v2700_v12 = vadd.f32 %v1818_v8, %v1121_v6  ;;  %v1122_v14 = vadd.f32 %v1117_v35, %v1074_v28  ;;  %v1924_v23 = vpop.f32.mrb[7].mxu0 }
 0x818   :  { %v1130_v2 = vmax.f32 %v2700_v12, 0.0  ;;  %v2706_v9 = vadd.f32 %v1818_v8, %v1122_v14 }
 0x81a   :  { %v1131_v61 = vmax.f32 %v2706_v9, 0.0  ;;  %v1137_v28 = vmul.f32 %v1819_v24, %v1130_v2 }
 0x81c   :  { %1139 = vadd.xlane.f32.xlu0 %v1137_v28  ;;  %v1138_v45 = vmul.f32 %v1819_v24, %v1131_v61 }
 0x81e   :  { %1141 = vadd.xlane.f32.xlu1 %v1138_v45 }
 0x820   :  { %1168 = vadd.xlane.f32.xlu0 %v1167_v32 }
 0x822   :  { %1171 = vadd.xlane.f32.xlu1 %v1170_v50 }
 0x8a9   :  { %v1140_v59 = vpop.xlane.xlu0 %1139 }
 0x8aa   :  { %2133 = vtanh.f32 %v1140_v59 }
 0x8ab   :  { %v1142_v34 = vpop.xlane.xlu1 %1141 }
 0x8ac   :  { %2135 = vtanh.f32 %v1142_v34 }
 0x8b4   :  { %v2735_v47 = vpop.eup %2133 }
 0x8b5   :  { %v1148_v49 = vsel %vm3047_vm7, %v2735_v47, -1e+30 }
 0x8b6   :  { %v2741_v52 = vpop.eup %2135  ;;  %v1150_v33 = vsel %vm2363_vm2, %v1148_v49, 0.0 }
 0x8b7   :  { %v1149_v8 = vsel %vm3048_vm12, %v2741_v52, -1e+30  ;;  %v1152_v51 = vsel %vm3102_vm5, %v1150_v33, 0.0 }
 0x8b8   :  { %v1151_v6 = vsel %vm3085_vm0, %v1149_v8, 0.0 }
 0x8b9   :  { %v1153_v35 = vsel %vm3103_vm4, %v1151_v6, 0.0  ;;  %vm3105_vm4 = vcmp.lt.s32.totalorder %v2350_v37, %v2348_v36  ;;  %v1172_v36 = vpop.xlane.xlu1 %1171  ;;  %v1169_v37 = vpop.xlane.xlu0 %1168 }
 0x8ba   :  { %v1154_v14 = vadd.f32 %v1153_v35, %v1152_v51  ;;  %v1174_v57 = vmul.f32 0.8, %v1172_v36  ;;  %v1173_v29 = vmul.f32 0.8, %v1169_v37 }
 0x8bc   :  { %v1155_v23 = vrot.slane %v1154_v14, 4  ;;  %v1176_v50 = vceil.f32 %v1174_v57 }
 0x8be   :  { %v1156_v24 = vadd.f32 %v1155_v23, %v1154_v14 }
 0x8c0   :  { %v1157_v28 = vrot.slane %v1156_v24, 2 }
 0x8c2   :  { %v1158_v45 = vadd.f32 %v1157_v28, %v1156_v24 }
 0x8c4   :  { %v1159_v30 = vrot.slane %v1158_v45, 1 }
 0x8c6   :  { %v1160_v31 = vadd.f32 %v1159_v30, %v1158_v45 }
 0x8c8   :  { %vm1178_vm14 = vcmp.gt.f32.partialorder %v1160_v31, %v1149_v8  ;;  %vm1180_vm2 = vcmp.eq.f32.partialorder %v1160_v31, %v1149_v8  ;;  %vm1179_vm12 = vcmp.eq.f32.partialorder %v1160_v31, %v1148_v49  ;;  %vm1177_vm0 = vcmp.gt.f32.partialorder %v1160_v31, %v1148_v49 }
 0x8c9   :  { %vm1182_vm7 = vmand %vm1180_vm2, %vm3104_vm15  ;;  %vm3120_vm15 = vcmp.eq.f32.partialorder %v2334_v25, 0.0 }
 0x8ca   :  { %vm1184_vm6 = vmor %vm1178_vm14, %vm1182_vm7  ;;  %vm3117_vm14 = vcmp.gt.f32.partialorder %v2605_v42, 0.5  ;;  %v2100_v42 = vld [vmem:[#allocation4 + $0x18] sm:$0xff]  }
 0x8cb   :  { %vm1186_vm5 = vmand %vm2721_vm10, %vm1184_vm6  ;;  %vm3114_vm10 = vcmp.eq.f32.partialorder %v2340_v26, 1.0 }
 0x8cc   :  { %v1188_v43 = vsel %vm1186_vm5, 1.0, %v2227_v18  ;;  %vm1181_vm8 = vmand %vm1179_vm12, %vm3105_vm4  ;;  %vm3123_vm5 = vcmask 7168   ;;  %vm3124_vm4 = vcmp.eq.f32.partialorder %v2334_v25, 1.0 }
 0x8cd   :  { %v1192_v48 = vsel %vm3106_vm9, %v1188_v43, 0.0  ;;  %vm1183_vm3 = vmor %vm1177_vm0, %vm1181_vm8 }
 0x8ce   :  { %1193 = vadd.xlane.f32.xlu1 %v1192_v48  ;;  %vm1185_vm11 = vmand %vm2711_vm1, %vm1183_vm3  ;;  %vm3111_vm3 = vcmp.eq.f32.partialorder %v2340_v26, 0.0 }
 0x8cf   :  { %v1187_v44 = vsel %vm1185_vm11, 1.0, %v2227_v18  ;;  %vm3107_vm7 = vmmov %vm3106_vm9  ;;  %vm3108_vm11 = vcmp.gt.f32.partialorder %v2641_v62, 0.5 }
 0x8d0   :  { %v1189_v32 = vsel %vm3107_vm7, %v1187_v44, 0.0 }
 0x8d1   :  { %1190 = vadd.xlane.f32.xlu0 %v1189_v32 }
 0x8d2   :  { %476 = vadd.xlane.f32.xlu1 %v2523_v21 }
 0x8d5   :  { %412 = vadd.xlane.f32.xlu0 %v2521_v20  ;;  %v1175_v20 = vceil.f32 %v1173_v29 }
 0x8d6   :  { %884 = vadd.xlane.f32.xlu1 %v2687_v41 }
 0x8d9   :  { %820 = vadd.xlane.f32.xlu0 %v2685_v39 }
 0x8e7   :  { %1995 = vperm.xlu1 %1987, %v1994_v27   ;;  %v2102_v27 = vld [vmem:[#allocation4 + $0x20] sm:$0xff]  }
 0x8eb   :  { %2000 = vperm.xlu1 %1987, %v1999_v15  }
 0x95b   :  { %v1194_v21 = vpop.xlane.xlu1 %1193 }
 0x95c   :  { %vm1196_vm6 = vcmp.lt.f32.partialorder %v1194_v21, %v1176_v50 }
 0x95d   :  { %vm2779_vm9 = vmand %vm3108_vm11, %vm1196_vm6 }
 0x95e   :  { %v1191_v54 = vpop.xlane.xlu0 %1190  ;;  %vm2787_vm8 = vmand %vm3111_vm3, %vm2779_vm9 }
 0x95f   :  { %vm1195_vm1 = vcmp.lt.f32.partialorder %v1191_v54, %v1175_v20  ;;  %vm2795_vm12 = vmand %vm3114_vm10, %vm2779_vm9  ;;  %v477_v15 = vpop.xlane.xlu1 %476  ;;  %v1823_v62 = vsel %vm2787_vm8, 1.0, %v2227_v18  ;;  %vm3131_vm10 = vnez %v3064_v40  ;;  %v1210_v58 = vsel %vm2787_vm8, 1, %v2226_v0 }
 0x960   :  { %vm2804_vm2 = vmand %vm3117_vm14, %vm1195_vm1  ;;  %v478_v41 = vrot.slane %v477_v15, 4  ;;  %v1825_v26 = vsel %vm2795_vm12, 1.0, %v2227_v18  ;;  %v1214_v59 = vsel %vm3123_vm5, %v1823_v62, 0.0  ;;  %vm3130_vm1 = vnez %v3060_v63 }
 0x961   :  { %vm2815_vm0 = vmand %vm3120_vm15, %vm2804_vm2  ;;  %vm3132_vm14 = vnez %v3058_v60  ;;  %v877_v63 = vsel %vm2619_vm13, 1, %v2226_v0  ;;  %vm3133_vm15 = vnez %v3075_v46  ;;  %vm3135_vm13 = vnez %v3062_v7 }
 0x962   :  { %vm2824_vm7 = vmand %vm3124_vm4, %vm2804_vm2  ;;  %v413_v34 = vpop.xlane.xlu0 %412  ;;  %v479_v49 = vadd.f32 %v478_v41, %v477_v15  ;;  %v1822_v8 = vsel %vm2815_vm0, 1.0, %v2227_v18  ;;  %v813_v40 = vsel %vm3133_vm15, 1, %v2226_v0  ;;  %v405_v46 = vsel %vm3135_vm13, 1, %v2226_v0 }
 0x963   :  { %vm3127_vm6 = vmmov %vm3123_vm5  ;;  %v414_v6 = vrot.slane %v413_v34, 4  ;;  %v1824_v51 = vsel %vm2824_vm7, 1.0, %v2227_v18  ;;  %v885_v25 = vpop.xlane.xlu1 %884  ;;  %v2014_v3 = vpack.i.bf16 %v1823_v62, %v1822_v8  ;;  %vm3136_vm4 = vnez %v3083_v4  ;;  %v2097_v4 = vld [vmem:[#allocation4 + $0x50] sm:$0xff]  }
 0x964   :  { %v1278_v33 = vsel %vm3127_vm6, %v1825_v26, 0.0  ;;  %vm3128_vm11 = vmmov %vm3123_vm5  ;;  %v480_v14 = vrot.slane %v479_v49, 2  ;;  %v886_v30 = vrot.slane %v885_v25, 4  ;;  %v2009_v13 = vpack.i.bf16 %v1825_v26, %v1824_v51  ;;  %v2098_v62 = vld [vmem:[#allocation4 + $0x10] sm:$0xff]   ;;  %v2099_v26 = vld [vmem:[#allocation4 + $0x58] sm:$0xff]  }
 0x965   :  { %v1213_v35 = vsel %vm3128_vm11, %v1822_v8, 0.0  ;;  %vm3129_vm3 = vmmov %vm3123_vm5  ;;  %v415_v28 = vadd.f32 %v414_v6, %v413_v34  ;;  %v469_v6 = vsel %vm3130_vm1, 1, %v2226_v0  ;;  %vm3134_vm5 = vnez %v3088_v56  ;;  %v2101_v8 = vld [vmem:[#allocation4 + $0x60] sm:$0xff]  }
 0x966   :  { %v1277_v23 = vsel %vm3129_vm3, %v1824_v51, 0.0  ;;  %v1215_v24 = vadd.f32 %v1214_v59, %v1213_v35  ;;  %v821_v31 = vpop.xlane.xlu0 %820  ;;  %v481_v43 = vadd.f32 %v480_v14, %v479_v49  ;;  %v887_v32 = vadd.f32 %v886_v30, %v885_v25  ;;  %v2104_v51 = vld [vmem:[#allocation4 + $0x28] sm:$0xff]   ;;  %v2105_v14 = vld [vmem:[#allocation4 + $0x70] sm:$0xff]  }
 0x967   :  { %v1279_v45 = vadd.f32 %v1278_v33, %v1277_v23  ;;  %v416_v48 = vrot.slane %v415_v28, 2  ;;  %v822_v44 = vrot.slane %v821_v31, 4  ;;  %v470_v35 = vsel %vm3131_vm10, 1, %v2226_v0  ;;  %v2106_v23 = vld [vmem:[#allocation4 + $0x30] sm:$0xff]   ;;  %v2110_v30 = vld [vmem:[#allocation6 + $0x8] sm:$0xff]  }
 0x968   :  { %1216 = vadd.xlane.f32.xlu0 %v1215_v24  ;;  %v482_v36 = vrot.slane %v481_v43, 1  ;;  %v888_v57 = vrot.slane %v887_v32, 2  ;;  %v404_v25 = vsel %vm3132_vm14, 1, %v2226_v0  ;;  %v878_v60 = vsel %vm3134_vm5, 1, %v2226_v0  ;;  %v2107_v24 = vld [vmem:[#allocation4 + $0x78] sm:$0xff]  }
 0x969   :  { %1280 = vadd.xlane.f32.xlu1 %v1279_v45  ;;  %v823_v37 = vadd.f32 %v822_v44, %v821_v31  ;;  %v417_v29 = vadd.f32 %v416_v48, %v415_v28  ;;  %v814_v53 = vsel %vm3136_vm4, 1, %v2226_v0  ;;  %v1273_v56 = vsel %vm2824_vm7, 1, %v2226_v0  ;;  %v2108_v28 = vld [vmem:[#allocation4 + $0x38] sm:$0xff]   ;;  %v2109_v45 = vld [vmem:[#allocation6] sm:$0xff]   ;;  %v2111_v31 = vld [vmem:[#allocation6 + $0x10] sm:$0xff]  }
 0x96a   :  { %v889_v20 = vadd.f32 %v888_v57, %v887_v32  ;;  %v483_v54 = vadd.f32 %v482_v36, %v481_v43  ;;  %v1209_v7 = vsel %vm2815_vm0, 1, %v2226_v0  ;;  %1926 = vmatpush3.bf16.msra.mxu1 %v2109_v45  ;;  %v2112_v43 = vld [vmem:[#allocation6 + $0x18] sm:$0xff]   ;;  %v2113_v48 = vld [vmem:[#allocation6 + $0x20] sm:$0xff]   ;;  %v2114_v44 = vld [vmem:[#allocation6 + $0x28] sm:$0xff]   ;;  %v1996_v32 = vpop.permute.xlu1 %1995 }
 0x96b   :  { %v824_v50 = vrot.slane %v823_v37, 2  ;;  %v418_v21 = vrot.slane %v417_v29, 1  ;;  %1927 = vmatprep.subr.bf16.mxu1 %v2227_v18 }
 0x96c   :  { %v890_v59 = vrot.slane %v889_v20, 1 }
 0x96d   :  { %v419_v15 = vadd.f32 %v418_v21, %v417_v29  ;;  %v825_v41 = vadd.f32 %v824_v50, %v823_v37 }
 0x96e   :  { %v891_v33 = vadd.f32 %v890_v59, %v889_v20  ;;  %1928 = vmatpush3.bf16.msra.mxu1 %v2110_v30  ;;  %v2886_v36 = vpop.permute.xlu1 %2000 }
 0x96f   :  { %1965 = vpush %v419_v15  ;;  %v826_v34 = vrot.slane %v825_v41, 1  ;;  %1929 = vmatprep.subr.bf16.mxu1 %v2227_v18 }
 0x970   :  { %1967 = vpush %v483_v54 }
 0x971   :  { %v827_v49 = vadd.f32 %v826_v34, %v825_v41 }
 0x972   :  { %1930 = vmatpush3.bf16.msra.mxu1 %v2111_v31 }
 0x973   :  { %1969 = vpush %v827_v49  ;;  %1931 = vmatprep.subr.bf16.mxu1 %v2227_v18 }
 0x974   :  { %1971 = vpush %v891_v33 }
 0x976   :  { %1932 = vmatpush3.bf16.msra.mxu1 %v2112_v43  ;;  %v2003_v43 = vunpack.i.h.bf16 %v2886_v36 }
 0x977   :  { %1933 = vmatprep.subr.bf16.mxu1 %v2227_v18 }
 0x97a   :  { %509 = vperm.xlu1 %1987, %v469_v6   ;;  %1934 = vmatpush3.bf16.msra.mxu1 %v2113_v48 }
 0x97b   :  { %1935 = vmatprep.subr.bf16.mxu1 %v2227_v18 }
 0x97e   :  { %512 = vperm.xlu1 %1987, %v470_v35   ;;  %1990 = vperm.xlu0 %1988, %v1989_v22   ;;  %v1274_v22 = vsel %vm2795_vm12, 1, %v2226_v0  ;;  %v2103_v0 = vld [vmem:[#allocation4 + $0x68] sm:$0xff]  }
 0x97f   :  { %1936 = vmatpush3.bf16.msra.mxu1 %v2114_v44 }
 0x980   :  { %1937 = vmatprep.subr.bf16.mxu1 %v2227_v18 }
 0x982   :  { %2005 = vperm.xlu1 %1987, %v2004_v16   ;;  %445 = vperm.xlu0 %1988, %v404_v25   ;;  %v2094_v16 = vld [vmem:[#allocation4] sm:$0xff]  }
 0x983   :  { %1868 = vmatpush3.bf16.msra.mxu0 %v2094_v16 }
 0x984   :  { %1869 = vmatprep.subr.bf16.mxu0 %v2095_v1 }
 0x986   :  { %917 = vperm.xlu1 %1987, %v877_v63   ;;  %853 = vperm.xlu0 %1988, %v813_v40  }
 0x987   :  { %1870 = vmatpush3.bf16.msra.mxu0 %v2096_v11 }
 0x988   :  { %1871 = vmatprep.subr.bf16.mxu0 %v2097_v4  ;;  %v1997_v4 = vunpack.i.l.bf16 %v1996_v32 }
 0x98a   :  { %920 = vperm.xlu1 %1987, %v878_v60   ;;  %2015 = vperm.xlu0 %1988, %v2014_v3   ;;  %v1820_v60 = vsel %vm2804_vm2, 1.0, %v2227_v18 }
 0x98b   :  { %1872 = vmatpush3.bf16.msra.mxu0 %v2098_v62 }
 0x98c   :  { %1873 = vmatprep.subr.bf16.mxu0 %v2099_v26 }
 0x98e   :  { %2010 = vperm.xlu1 %1987, %v2009_v13   ;;  %1316 = vperm.xlu0 %1988, %v1274_v22   ;;  %v1821_v13 = vsel %vm2779_vm9, 1.0, %v2227_v18 }
 0x98f   :  { %1874 = vmatpush3.bf16.msra.mxu0 %v2100_v42 }
 0x990   :  { %1875 = vmatprep.subr.bf16.mxu0 %v2101_v8 }
 0x992   :  { %448 = vperm.xlu1 %1987, %v405_v46   ;;  %1252 = vperm.xlu0 %1988, %v1210_v58   ;;  %v1203_v46 = vmul.f32 %v2735_v47, %v1820_v60  ;;  %v1204_v58 = vmul.f32 %v2741_v52, %v1821_v13  ;;  %v1998_v47 = vunpack.i.h.bf16 %v1996_v32 }
 0x993   :  { %1876 = vmatpush3.bf16.msra.mxu0 %v2102_v27 }
 0x994   :  { %1877 = vmatprep.subr.bf16.mxu0 %v2103_v0  ;;  %v2906_v38 = vmul.f32 %v1204_v58, %v1131_v61  ;;  %v905_v9 = vmul.f32 %v1998_v47, %v2681_v19  ;;  %v904_v61 = vmul.f32 %v1997_v4, %v2638_v55 }
 0x996   :  { %856 = vperm.xlu1 %1987, %v814_v53  }
 0x997   :  { %1878 = vmatpush3.bf16.msra.mxu0 %v2104_v51 }
 0x998   :  { %1879 = vmatprep.subr.bf16.mxu0 %v2105_v14 }
 0x99a   :  { %1313 = vperm.xlu1 %1987, %v1273_v56  }
 0x99b   :  { %1880 = vmatpush3.bf16.msra.mxu0 %v2106_v23  ;;  %v906_v23 = vadd.f32 %v905_v9, %v904_v61 }
 0x99c   :  { %1881 = vmatprep.subr.bf16.mxu0 %v2107_v24 }
 0x99e   :  { %1249 = vperm.xlu1 %1987, %v1209_v7   ;;  %v2902_v7 = vmul.f32 %v1203_v46, %v1130_v2 }
 0x99f   :  { %1882 = vmatpush3.bf16.msra.mxu0 %v2108_v28 }
 0x9a0   :  { %1945 = vmatprep.subr.bf16.mxu0 %v2227_v18  ;;  %s2942_s8 = spop %1965 }
 0x9a1   :  { %s2944_s9 = spop %1967  ;;  %v421_v9 = vstv %s2942_s8 }
 0x9a2   :  { %vm2961_vm15 = vcmp.gt.f32.partialorder %v421_v9, 0.5 }
 0x9a4   :  { %s2946_s10 = spop %1969 }
 0x9a5   :  { %s2949_s13 = spop %1971 }
 0x9f5   :  { %v1217_v37 = vpop.xlane.xlu0 %1216 }
 0x9f6   :  { %v1218_v57 = vrot.slane %v1217_v37, 4  ;;  %v1281_v29 = vpop.xlane.xlu1 %1280 }
 0x9f7   :  { %v1282_v50 = vrot.slane %v1281_v29, 4 }
 0x9f8   :  { %v1219_v21 = vadd.f32 %v1218_v57, %v1217_v37  ;;  %v2002_v37 = vunpack.i.l.bf16 %v2886_v36 }
 0x9f9   :  { %v1283_v20 = vadd.f32 %v1282_v50, %v1281_v29 }
 0x9fa   :  { %v1220_v54 = vrot.slane %v1219_v21, 2  ;;  %v510_v15 = vpop.permute.xlu1 %509 }
 0x9fb   :  { %v1284_v41 = vrot.slane %v1283_v20, 2  ;;  %vm514_vm12 = vcmp.eq.s32.totalorder %v510_v15, 1 }
 0x9fc   :  { %v1221_v59 = vadd.f32 %v1220_v54, %v1219_v21  ;;  %v516_v24 = vsel %vm514_vm12, %v2474_v5, -1e+30  ;;  %vm1341_vm12 = vcmask 1040384  }
 0x9fd   :  { %v2888_v34 = vpop.permute.xlu0 %1990  ;;  %v1285_v33 = vadd.f32 %v1284_v41, %v1283_v20 }
 0x9fe   :  { %v513_v49 = vpop.permute.xlu1 %512  ;;  %v1222_v6 = vrot.slane %v1221_v59, 1  ;;  %v1993_v57 = vunpack.i.h.bf16 %v2888_v34  ;;  %v1992_v50 = vunpack.i.l.bf16 %v2888_v34  ;;  %v433_v34 = vmul.f32 %v2003_v43, %v2517_v17 }
 0x9ff   :  { %v1286_v35 = vrot.slane %v1285_v33, 1  ;;  %vm515_vm9 = vcmp.eq.s32.totalorder %v513_v49, 1  ;;  %v829_v43 = vstv %s2946_s10 }
 0xa00   :  { %v1223_v25 = vadd.f32 %v1222_v6, %v1221_v59  ;;  %v517_v27 = vsel %vm515_vm9, %v2517_v17, -1e+30  ;;  %v907_v6 = vrot.slane %v906_v23, 4  ;;  %v496_v60 = vmul.f32 %v1992_v50, %v2474_v5 }
 0xa01   :  { %v446_v63 = vpop.permute.xlu0 %445  ;;  %v1287_v40 = vadd.f32 %v1286_v35, %v1285_v33  ;;  %v518_v30 = vmax.f32 %v516_v24, %v517_v27  ;;  %vm2971_vm13 = vcmp.gt.f32.partialorder %v829_v43, 0.5 }
 0xa02   :  { %v2890_v3 = vpop.permute.xlu1 %2005  ;;  %1973 = vpush %v1223_v25  ;;  %vm450_vm6 = vcmp.eq.s32.totalorder %v446_v63, 1  ;;  %v432_v63 = vmul.f32 %v2002_v37, %v2474_v5 }
 0xa03   :  { %1975 = vpush %v1287_v40  ;;  %v452_v21 = vsel %vm450_vm6, %v2474_v5, -1e+30  ;;  %v2008_v20 = vunpack.i.h.bf16 %v2890_v3  ;;  %v2007_v54 = vunpack.i.l.bf16 %v2890_v3  ;;  %v519_v59 = vrot.slane %v518_v30, 4 }
 0xa04   :  { %v497_v3 = vmul.f32 %v1993_v57, %v2517_v17 }
 0xa05   :  { %v854_v22 = vpop.permute.xlu0 %853  ;;  %v841_v13 = vmul.f32 %v2008_v20, %v2681_v19  ;;  %v520_v58 = vmax.f32 %v518_v30, %v519_v59  ;;  %v485_v30 = vstv %s2944_s9 }
 0xa06   :  { %v918_v53 = vpop.permute.xlu1 %917  ;;  %vm858_vm0 = vcmp.eq.s32.totalorder %v854_v22, 1  ;;  %v840_v22 = vmul.f32 %v2007_v54, %v2638_v55  ;;  %v498_v5 = vadd.f32 %v497_v3, %v496_v60  ;;  %vm2967_vm5 = vcmp.gt.f32.partialorder %v485_v30, 0.5 }
 0xa07   :  { %vm922_vm2 = vcmp.eq.s32.totalorder %v918_v53, 1  ;;  %v860_v48 = vsel %vm858_vm0, %v2638_v55, -1e+30 }
 0xa08   :  { %v924_v28 = vsel %vm922_vm2, %v2638_v55, -1e+30  ;;  %v499_v61 = vrot.slane %v498_v5, 4  ;;  %vm3147_vm2 = vmmov 0  }
 0xa09   :  { %v2016_v56 = vpop.permute.xlu0 %2015 }
 0xa0a   :  { %v2018_v10 = vunpack.i.h.bf16 %v2016_v56  ;;  %v2017_v16 = vunpack.i.l.bf16 %v2016_v56  ;;  %v921_v39 = vpop.permute.xlu1 %920 }
 0xa0b   :  { %vm923_vm8 = vcmp.eq.s32.totalorder %v921_v39, 1 }
 0xa0c   :  { %v1236_v1 = vmul.f32 %v2017_v16, %v2902_v7  ;;  %v1237_v11 = vmul.f32 %v2018_v10, %v2906_v38  ;;  %v925_v0 = vsel %vm923_vm8, %v2681_v19, -1e+30 }
 0xa0d   :  { %v1317_v51 = vpop.permute.xlu0 %1316  ;;  %v926_v31 = vmax.f32 %v924_v28, %v925_v0 }
 0xa0e   :  { %v2910_v52 = vadd.f32 %v1237_v11, %v1236_v1  ;;  %v2011_v62 = vpop.permute.xlu1 %2010  ;;  %vm1319_vm3 = vcmp.eq.s32.totalorder %v1317_v51, 1  ;;  %v434_v11 = vadd.f32 %v433_v34, %v432_v63 }
 0xa0f   :  { %v2013_v26 = vunpack.i.h.bf16 %v2011_v62  ;;  %v2012_v12 = vunpack.i.l.bf16 %v2011_v62  ;;  %v927_v33 = vrot.slane %v926_v31, 4  ;;  %v1321_v36 = vsel %vm1319_vm3, %v2906_v38, -1e+30 }
 0xa10   :  { %v1239_v57 = vrot.slane %v2910_v52, 4 }
 0xa11   :  { %v1301_v2 = vmul.f32 %v2013_v26, %v2906_v38  ;;  %v1300_v42 = vmul.f32 %v2012_v12, %v2902_v7  ;;  %v1253_v15 = vpop.permute.xlu0 %1252  ;;  %v928_v53 = vmax.f32 %v926_v31, %v927_v33  ;;  %v908_v26 = vadd.f32 %v907_v6, %v906_v23 }
 0xa12   :  { %v449_v8 = vpop.permute.xlu1 %448  ;;  %vm1255_vm10 = vcmp.eq.s32.totalorder %v1253_v15, 1  ;;  %v849_v33 = vmax.f32 %v829_v43, 1.0  ;;  %v1240_v34 = vadd.f32 %v1239_v57, %v2910_v52  ;;  %v2118_v52 = vld [vmem:[#allocation6 + $0x48] sm:$0xff]  }
 0xa13   :  { %v2918_v14 = vadd.f32 %v1301_v2, %v1300_v42  ;;  %vm451_vm7 = vcmp.eq.s32.totalorder %v449_v8, 1  ;;  %v1257_v10 = vsel %vm1255_vm10, %v2906_v38, -1e+30  ;;  %v929_v55 = vrot.slane %v928_v53, 2 }
 0xa14   :  { %v453_v44 = vsel %vm451_vm7, %v2517_v17, -1e+30  ;;  %v842_v17 = vadd.f32 %v841_v13, %v840_v22  ;;  %v435_v2 = vrot.slane %v434_v11, 4  ;;  %v909_v51 = vrot.slane %v908_v26, 2 }
 0xa15   :  { %v454_v49 = vmax.f32 %v452_v21, %v453_v44  ;;  %v930_v27 = vmax.f32 %v928_v53, %v929_v55  ;;  %v500_v44 = vadd.f32 %v499_v61, %v498_v5  ;;  %v505_v21 = vmax.f32 %v485_v30, 1.0 }
 0xa16   :  { %v857_v45 = vpop.permute.xlu1 %856  ;;  %v843_v42 = vrot.slane %v842_v17, 4  ;;  %v2951_v28 = vadd.f32 %v435_v2, %v434_v11  ;;  %v1303_v20 = vrot.slane %v2918_v14, 4 }
 0xa17   :  { %vm859_vm11 = vcmp.eq.s32.totalorder %v857_v45, 1  ;;  %v455_v56 = vrot.slane %v454_v49, 4  ;;  %v441_v45 = vmax.f32 %v421_v9, 1.0 }
 0xa18   :  { %v861_v32 = vsel %vm859_vm11, %v2681_v19, -1e+30  ;;  %v521_v19 = vrot.slane %v520_v58, 2  ;;  %v437_v59 = vrot.slane %v2951_v28, 2  ;;  %v1304_v60 = vadd.f32 %v1303_v20, %v2918_v14 }
 0xa19   :  { %v862_v29 = vmax.f32 %v860_v48, %v861_v32  ;;  %v456_v4 = vmax.f32 %v454_v49, %v455_v56  ;;  %v893_v48 = vstv %s2949_s13  ;;  %v844_v32 = vadd.f32 %v843_v42, %v842_v17 }
 0xa1a   :  { %v1314_v41 = vpop.permute.xlu1 %1313  ;;  %v522_v8 = vmax.f32 %v520_v58, %v521_v19  ;;  %2137 = vrcp.f32 %v441_v45  ;;  %vm2975_vm4 = vcmp.gt.f32.partialorder %v893_v48, 0.5  ;;  %v1241_v14 = vrot.slane %v1240_v34, 2  ;;  %v2116_v58 = vld [vmem:[#allocation6 + $0x38] sm:$0xff]  }
 0xa1b   :  { %vm1318_vm1 = vcmp.eq.s32.totalorder %v1314_v41, 1  ;;  %v863_v35 = vrot.slane %v862_v29, 4  ;;  %v457_v0 = vrot.slane %v456_v4, 2  ;;  %v2958_v41 = vadd.f32 %v909_v51, %v908_v26 }
 0xa1c   :  { %v1320_v25 = vsel %vm1318_vm1, %v2902_v7, -1e+30  ;;  %v523_v37 = vrot.slane %v522_v8, 1  ;;  %2139 = vrcp.f32 %v505_v21  ;;  %v1305_v11 = vrot.slane %v1304_v60, 2 }
 0xa1d   :  { %v1322_v40 = vmax.f32 %v1320_v25, %v1321_v36  ;;  %v864_v16 = vmax.f32 %v862_v29, %v863_v35  ;;  %v931_v29 = vrot.slane %v930_v27, 1  ;;  %v458_v50 = vmax.f32 %v456_v4, %v457_v0 }
 0xa1e   :  { %v1250_v46 = vpop.permute.xlu1 %1249  ;;  %v913_v36 = vmax.f32 %v893_v48, 1.0  ;;  %v501_v35 = vrot.slane %v500_v44, 2  ;;  %v845_v25 = vrot.slane %v844_v32, 2  ;;  %2141 = vrcp.f32 %v849_v33 }
 0xa1f   :  { %vm1254_vm14 = vcmp.eq.s32.totalorder %v1250_v46, 1  ;;  %v1323_v39 = vrot.slane %v1322_v40, 4  ;;  %v865_v12 = vrot.slane %v864_v16, 2  ;;  %v459_v63 = vrot.slane %v458_v50, 1  ;;  %v2115_v46 = vld [vmem:[#allocation6 + $0x30] sm:$0xff]  }
 0xa20   :  { %v1256_v1 = vsel %vm1254_vm14, %v2902_v7, -1e+30  ;;  %v932_v3 = vmax.f32 %v930_v27, %v931_v29  ;;  %2143 = vrcp.f32 %v913_v36  ;;  %v502_v56 = vadd.f32 %v501_v35, %v500_v44  ;;  %1938 = vmatpush3.bf16.msra.mxu1 %v2115_v46 }
 0xa21   :  { %v1258_v47 = vmax.f32 %v1256_v1, %v1257_v10  ;;  %v1324_v38 = vmax.f32 %v1322_v40, %v1323_v39  ;;  %v866_v23 = vmax.f32 %v864_v16, %v865_v12  ;;  %v524_v40 = vmax.f32 %v522_v8, %v523_v37  ;;  %1939 = vmatprep.subr.bf16.mxu1 %v2227_v18 }
 0xa22   :  { %v846_v10 = vadd.f32 %v845_v25, %v844_v32  ;;  %v460_v16 = vmax.f32 %v458_v50, %v459_v63  ;;  %v936_v1 = vsel %vm2975_vm4, %v932_v3, 0.0  ;;  %v503_v26 = vrot.slane %v502_v56, 1 }
 0xa23   :  { %v1259_v62 = vrot.slane %v1258_v47, 4  ;;  %v1325_v24 = vrot.slane %v1324_v38, 2  ;;  %v867_v54 = vrot.slane %v866_v23, 1  ;;  %v528_v39 = vsel %vm2967_vm5, %v524_v40, 0.0 }
 0xa24   :  { %v937_v12 = vadd.f32 %v936_v1, %v528_v39  ;;  %v464_v2 = vsel %vm2961_vm15, %v460_v16, 0.0  ;;  %v2138_v61 = vpop.eup %2137  ;;  %v438_v42 = vadd.f32 %v437_v59, %v2951_v28  ;;  %v847_v0 = vrot.slane %v846_v10, 1  ;;  %1940 = vmatpush3.bf16.msra.mxu1 %v2116_v58  ;;  %v2122_v16 = vld [vmem:[#allocation6 + $0x68] sm:$0xff]   ;;  %v1826_v1 = vld [vmem:[%s3024_s4 + $0x6] ss:$0 sm:$0xff] }
 0xa25   :  { %v1260_v7 = vmax.f32 %v1258_v47, %v1259_v62  ;;  %v1326_v15 = vmax.f32 %v1324_v38, %v1325_v24  ;;  %v868_v13 = vmax.f32 %v866_v23, %v867_v54  ;;  %v1242_v51 = vadd.f32 %v1241_v14, %v1240_v34  ;;  %v2121_v14 = vld [vmem:[#allocation6 + $0x60] sm:$0xff]  }
 0xa26   :  { %v1306_v23 = vadd.f32 %v1305_v11, %v1304_v60  ;;  %v2140_v24 = vpop.eup %2139  ;;  %v911_v43 = vrot.slane %v2958_v41, 1  ;;  %v504_v48 = vadd.f32 %v503_v26, %v502_v56  ;;  %v439_v32 = vrot.slane %v438_v42, 1  ;;  %v2119_v56 = vld [vmem:[#allocation6 + $0x50] sm:$0xff]   ;;  %v2124_v26 = vld [vmem:[#allocation6 + $0x78] sm:$0xff]  }
 0xa27   :  { %v1261_v31 = vrot.slane %v1260_v7, 2  ;;  %v1327_v22 = vrot.slane %v1326_v15, 1  ;;  %v872_v47 = vsel %vm2971_vm13, %v868_v13, 0.0  ;;  %v848_v57 = vadd.f32 %v847_v0, %v846_v10  ;;  %v2120_v10 = vld [vmem:[#allocation6 + $0x58] sm:$0xff]  }
 0xa28   :  { %v873_v8 = vadd.f32 %v872_v47, %v464_v2  ;;  %v1243_v28 = vrot.slane %v1242_v51, 1  ;;  %v1307_v29 = vrot.slane %v1306_v23, 1  ;;  %v912_v50 = vadd.f32 %v911_v43, %v2958_v41 }
 0xa29   :  { %v1262_v49 = vmax.f32 %v1260_v7, %v1261_v31  ;;  %v1328_v17 = vmax.f32 %v1326_v15, %v1327_v22  ;;  %v2142_v31 = vpop.eup %2141  ;;  %v507_v21 = vmul.f32 %v2140_v24, %v504_v48  ;;  %v440_v20 = vadd.f32 %v439_v32, %v438_v42 }
 0xa2a   :  { %v2144_v44 = vpop.eup %2143  ;;  %v1244_v59 = vadd.f32 %v1243_v28, %v1242_v51  ;;  %v1308_v33 = vadd.f32 %v1307_v29, %v1306_v23 }
 0xa2b   :  { %v1263_v53 = vrot.slane %v1262_v49, 1  ;;  %v915_v15 = vmul.f32 %v2144_v44, %v912_v50  ;;  %v443_v36 = vmul.f32 %v2138_v61, %v440_v20 }
 0xa2d   :  { %v1264_v55 = vmax.f32 %v1262_v49, %v1263_v53  ;;  %v851_v49 = vmul.f32 %v2142_v31, %v848_v57  ;;  %v938_v35 = vadd.f32 %v915_v15, %v507_v21  ;;  %v2117_v53 = vld [vmem:[#allocation6 + $0x40] sm:$0xff]  }
 0xa2f   :  { %v874_v63 = vadd.f32 %v851_v49, %v443_v36 }
 0xa33   :  { %s1974_s14 = spop %1973 }
 0xa34   :  { %v1225_v5 = vstv %s1974_s14  ;;  %s1976_s15 = spop %1975 }
 0xa35   :  { %v1245_v19 = vmax.f32 %v1225_v5, 1.0  ;;  %vm2985_vm9 = vcmp.gt.f32.partialorder %v1225_v5, 0.5  ;;  %v1289_v62 = vstv %s1976_s15 }
 0xa36   :  { %v1309_v38 = vmax.f32 %v1289_v62, 1.0  ;;  %vm1329_vm8 = vcmp.gt.f32.partialorder %v1289_v62, 0.5  ;;  %v1268_v7 = vsel %vm2985_vm9, %v1264_v55, 0.0  ;;  %v2123_v62 = vld [vmem:[#allocation6 + $0x70] sm:$0xff]  }
 0xa37   :  { %2145 = vrcp.f32 %v1245_v19  ;;  %v1332_v9 = vsel %vm1329_vm8, %v1328_v17, 0.0  ;;  %v1269_v45 = vadd.f32 %v1268_v7, %v873_v8 }
 0xa38   :  { %2147 = vrcp.f32 %v1309_v38  ;;  %v1333_v27 = vadd.f32 %v1332_v9, %v937_v12  ;;  %v1843_v12 = vld [vmem:[%s3024_s4 + $0x7] ss:$0 sm:$0xff] }
 0xa3a   :  { %v1337_v30 = vrot.slane %v1333_v27, 7  ;;  %v1852_v27 = vld [vmem:[%s3024_s4 + $0x8] ss:$0 sm:$0xff] }
 0xa3c   :  { %v1342_v37 = vsel %vm1341_vm12, %v1269_v45, %v1337_v30 }
 0xa3d   :  { %v1347_v41 = vpack.c.bf16 %v1342_v37, %v1342_v37 }
 0xa41   :  { %v2146_v54 = vpop.eup %2145 }
 0xa42   :  { %v2148_v6 = vpop.eup %2147  ;;  %v1247_v25 = vmul.f32 %v2146_v54, %v1244_v59 }
 0xa43   :  { %v1311_v34 = vmul.f32 %v2148_v6, %v1308_v33 }
 0xa44   :  { %v1270_v3 = vadd.f32 %v1247_v25, %v874_v63 }
 0xa45   :  { %v1334_v40 = vadd.f32 %v1311_v34, %v938_v35 }
 0xa47   :  { %v1338_v60 = vrot.slane %v1334_v40, 7 }
 0xa49   :  { %v1343_v13 = vsel %vm1341_vm12, %v1270_v3, %v1338_v60 }
 0xa4a   :  { %v1348_v22 = vpack.c.bf16 %v1343_v13, %v1343_v13 }
 0xa4c   :  { %1513 = vmatprep.mubr.bf16.mxu0 %v1348_v22 }
 0xa4d   :  { %1514 = vmatmul.mubr.bf16.vlgmr.msra.gmra.mrb[8].mxu0 %v1347_v41 }
 0xa4e   :  { %1961 = vmatprep.mubr.msk.bf16.mxu0 %vm3147_vm2, %v2227_v18  ;;  %1946 = vmatpush3.bf16.msra.mxu0 %v2117_v53 }
 0xa4f   :  { %1947 = vmatprep.subr.bf16.mxu0 %v2227_v18 }
 0xa52   :  { %1948 = vmatpush3.bf16.msra.mxu0 %v2118_v52 }
 0xa53   :  { %1949 = vmatprep.subr.bf16.mxu0 %v2227_v18 }
 0xa56   :  { %1950 = vmatpush3.bf16.msra.mxu0 %v2119_v56 }
 0xa57   :  { %1951 = vmatprep.subr.bf16.mxu0 %v2227_v18 }
 0xa5a   :  { %1952 = vmatpush3.bf16.msra.mxu0 %v2120_v10 }
 0xa5b   :  { %1953 = vmatprep.subr.bf16.mxu0 %v2227_v18 }
 0xa5e   :  { %1954 = vmatpush3.bf16.msra.mxu0 %v2121_v14 }
 0xa5f   :  { %1955 = vmatprep.subr.bf16.mxu0 %v2227_v18 }
 0xa62   :  { %1956 = vmatpush3.bf16.msra.mxu0 %v2122_v16 }
 0xa63   :  { %1957 = vmatprep.subr.bf16.mxu0 %v2227_v18 }
 0xa66   :  { %1958 = vmatpush3.bf16.msra.mxu0 %v2123_v62 }
 0xa67   :  { %1959 = vmatprep.subr.bf16.mxu0 %v2227_v18 }
 0xa6a   :  { %1960 = vmatpush3.bf16.msra.mxu0 %v2124_v26 }
 0xb20   :  { %v1883_v39 = vpop.f32.mrb[8].mxu0 }
 0xb21   :  { %v1884_v11 = vpop.f32.mrb[9].mxu0 }
 0xb22   :  { %v1885_v47 = vadd.f32 %v1884_v11, %v1883_v39  ;;  %v1886_v5 = vpop.f32.mrb[10].mxu0 }
 0xb23   :  { %v1887_v17 = vpop.f32.mrb[11].mxu0 }
 0xb24   :  { %v1516_v19 = vadd.f32 %v1885_v47, %v1826_v1 }
 0xb26   :  { %v1521_v55 = vmax.f32 %v1516_v19, 0.0 }
 0xb28   :  { %v1522_v4 = vpack.c.bf16 %v1521_v55, %v1521_v55 }
 0xb2a   :  { %1942 = vmatmul.mubr.bf16.vlgmr.msra.gmra.mrb[16].mxu1 %v1522_v4 }
 0xbfd   :  { %v1625_v38 = vpop.f32.mrb[16].mxu1 }
 0xbfe   :  { %v1626_v2 = vadd.f32 %v1843_v12, %v1625_v38  ;;  %v1943_v7 = vpop.f32.mrb[17].mxu1 }
 0xbff   :  { %v1628_v9 = vpop.f32.mrb[18].mxu1 }
 0xc00   :  { %v1631_v61 = vmax.f32 %v1626_v2, 0.0  ;;  %v1944_v42 = vpop.f32.mrb[19].mxu1 }
 0xc02   :  { %v1632_v8 = vpack.c.bf16 %v1631_v61, %v1631_v61 }
 0xc04   :  { %1962 = vmatmul.mubr.bf16.vlgmr.msra.gmra.mrb[12].mxu0 %v1632_v8 }
 0xcd7   :  { %v1736_v0 = vpop.f32.mrb[12].mxu0 }
 0xcd8   :  { %v1737_v18 = vadd.f32 %v1852_v27, %v1736_v0  ;;  %v1963_v51 = vpop.f32.mrb[13].mxu0 }
 0xcd9   :  { %v1739_v23 = vpop.f32.mrb[14].mxu0 }
 0xcda   :  { %1742 = vst [vmem:[%s3027_s7] sm:$0x3] %v1737_v18  ;;  %v1964_v24 = vpop.f32.mrb[15].mxu0 }
 0xcdb   :  { %1747 = vsyncpa [#allocation3], 1 }
 0xcdc   :  { %1748 = vsyncpa [#allocation5], 1 }

</bundles_post_ra>
